<compile_context>
chip_gen: v5e
topology: v5e:2x2
jax: 0.10.0
libtpu: 0.0.40
codegen_flags: <defaults>
</compile_context>

<pallas_src>
import functools

import jax
import jax.numpy as jnp
from jax.experimental import pallas as pl
from jax.experimental.pallas import tpu as pltpu  # noqa: F401  (TPU backend)

# ----------------------------- logical model dims -----------------------------
BATCH = 2
SEQ = 8
HIDDEN = 32
NUM_HEADS = 2
D_HEAD = HIDDEN // NUM_HEADS
FFN = 64
VOCAB = 100
TYPE_VOCAB = 2
NUM_LAYERS = 2
LN_EPS = 1e-12

# ----------------------------- lane-padded sizes ------------------------------
HP = 128                      # padded hidden
DHP = 128                     # padded per-head width
FFP = 128                     # padded FFN
VOCAB_PAD = 128               # padded word vocab
EMB_ROWS = 2 * VOCAB_PAD      # combined word(0..127) + type(128..255) table rows

# packed per-layer weight-slab column offsets (all multiples of 128)
QKV_W = 3 * NUM_HEADS * DHP            # 768  : [Qh Kh Vh] per head, each 128 wide
WO_OFF = QKV_W                         # 768  : per-head output-projection blocks
W1_OFF = WO_OFF + NUM_HEADS * DHP      # 1024 : FFN in
W2_OFF = W1_OFF + FFP                  # 1152 : FFN out
W_COLS = W2_OFF + HP                   # 1280

# packed constant-slab row offsets (all multiples of 8)
POS_OFF = EMB_ROWS                               # 256 : position embeddings (tiled B*S rows)
POS_ROWS = ((BATCH * SEQ + 7) // 8) * 8          # 16
DW_OFF = POS_OFF + POS_ROWS                      # 272 : SimCSE dense weight (128 rows)
MISC_OFF = DW_OFF + HP                           # 400 : dense_b / emb LN gamma / emb LN beta
CONST_ROWS = MISC_OFF + 8                        # 408


# --------------------- fused encoder + pooler kernel (single call) ---------------------
def fused_forward_kernel(num_layers, num_heads, batch, seq, training,
                         ids_ref, mask_ref, const_ref, w_ref, vec_ref, out_ref):
    B, S, NH, L = batch, seq, num_heads, num_layers
    BS = B * S
    scale = 1.0 / (D_HEAD ** 0.5)
    inv_h = 1.0 / HIDDEN

    # lane mask over the padded hidden dim (1 for the 32 real lanes, 0 for padding)
    lane_mask = (jax.lax.broadcasted_iota(jnp.int32, (1, HP), 1) < HIDDEN
                 ).astype(jnp.float32)

    def layernorm(x, gamma, beta):
        xm = x * lane_mask
        mu = jnp.sum(xm, axis=-1, keepdims=True) * inv_h
        d = (x - mu) * lane_mask
        var = jnp.sum(d * d, axis=-1, keepdims=True) * inv_h
        return d * jax.lax.rsqrt(var + LN_EPS) * gamma + beta

    def gelu(x):
        # TODO(synk): tanh-approximate GELU; HF BERT default is exact erf GELU.
        c = 0.7978845608028654  # sqrt(2/pi)
        return 0.5 * x * (1.0 + jnp.tanh(c * (x + 0.044715 * x * x * x)))

    # ---- fused embeddings: combined word+type one-hot matmul + pos + LayerNorm ----
    wid = ids_ref[0]                                   # (BS, 1) word ids
    tid = ids_ref[1] + VOCAB_PAD                       # (BS, 1) type ids -> combined rows
    iota_r = jax.lax.broadcasted_iota(jnp.int32, (BS, EMB_ROWS), 1)
    onehot = ((iota_r == wid) | (iota_r == tid)).astype(jnp.float32)   # two one-hots summed
    x = jnp.dot(onehot, const_ref[0:EMB_ROWS, :],
                preferred_element_type=jnp.float32)    # (BS, HP) word + type embeddings
    x = x + const_ref[POS_OFF:POS_OFF + BS, :]         # pre-tiled position embeddings
    misc = const_ref[MISC_OFF:MISC_OFF + 8, :]         # rows: dense_b, emb_ln_g, emb_ln_b
    x = layernorm(x, misc[1:2, :], misc[2:3, :])

    # additive attention-mask bias, computed once, resident across all layers
    bias = ((mask_ref[...] - 1.0) * 1e9).reshape(B, 1, S)

    for l in range(L):        # static unroll (2 layers); grid-over-layers at real sizes
        vl = vec_ref[l]                                # (8, 768): all per-layer vectors
        # fused QKV projection: one lane-dense (BS,128)@(128,768) MXU push
        qkv = jnp.dot(x, w_ref[l, :, 0:QKV_W],
                      preferred_element_type=jnp.float32) + vl[0:1, :]

        attn_out = vl[1:2, 0:HP]                       # output-projection bias (1, HP)
        for h in range(NH):                            # 128-aligned per-head slabs
            base = 3 * DHP * h
            qh = qkv[:, base:base + DHP].reshape(B, S, DHP)
            kh = qkv[:, base + DHP:base + 2 * DHP].reshape(B, S, DHP)
            vh = qkv[:, base + 2 * DHP:base + 3 * DHP].reshape(B, S, DHP)

            scores = jnp.einsum('bqd,bkd->bqk', qh, kh,
                                preferred_element_type=jnp.float32) * scale + bias
            m = jnp.max(scores, axis=-1, keepdims=True)
            p = jnp.exp(scores - m)
            inv = pl.reciprocal(jnp.sum(p, axis=-1, keepdims=True), approx=True)
            ctx = jnp.einsum('bqk,bkd->bqd', p * inv, vh,
                             preferred_element_type=jnp.float32)       # (B, S, DHP)
            # per-head partial product against the matching (padded) rows of Wo
            attn_out = attn_out + jnp.dot(
                ctx.reshape(BS, DHP),
                w_ref[l, :, WO_OFF + h * DHP:WO_OFF + (h + 1) * DHP],
                preferred_element_type=jnp.float32)

        x1 = layernorm(x + attn_out, vl[2:3, 0:HP], vl[3:4, 0:HP])

        # ---- feed-forward ----
        hdn = gelu(jnp.dot(x1, w_ref[l, :, W1_OFF:W1_OFF + FFP],
                           preferred_element_type=jnp.float32) + vl[4:5, 0:FFP])
        ffn = jnp.dot(hdn, w_ref[l, :, W2_OFF:W2_OFF + HP],
                      preferred_element_type=jnp.float32) + vl[5:6, 0:HP]
        x = layernorm(x1 + ffn, vl[6:7, 0:HP], vl[7:8, 0:HP])

    # ---- SimCSE pooler on the resident hidden state: CLS rows -> dense -> tanh ----
    cls = jnp.concatenate([x[b * S:b * S + 1, :] for b in range(B)], axis=0)   # (B, HP)
    if training:
        out_ref[...] = jnp.tanh(
            jnp.dot(cls, const_ref[DW_OFF:DW_OFF + HP, :],
                    preferred_element_type=jnp.float32) + misc[0:1, :])
    else:
        out_ref[...] = cls


# ------------------------------- jitted forward -------------------------------
@functools.partial(jax.jit, static_argnames=("training",))
def simcse_forward(packed, input_ids, attention_mask, token_type_ids, training=True):
    B, S = input_ids.shape
    # (2, B*S, 1): word ids and token-type ids, laid out for lane-broadcast compares
    ids = jnp.stack([input_ids.astype(jnp.int32),
                     token_type_ids.astype(jnp.int32)], axis=0).reshape(2, B * S, 1)
    mask = attention_mask.astype(jnp.float32)                      # (B, S)

    kernel = functools.partial(fused_forward_kernel,
                               NUM_LAYERS, NUM_HEADS, B, S, training)
    # Single invocation, no grid: every operand is one whole-array VMEM block.
    out = pl.pallas_call(
        kernel,
        out_shape=jax.ShapeDtypeStruct((B, HP), jnp.float32),
    )(ids, mask, packed["const"], packed["w"], packed["vec"])
    return out[:, :HIDDEN]    # lane-dense (B,128) store in-kernel; slice to 32 here


# ------------------------------- parameters -------------------------------
def init_params(key):
    std = 0.02
    keys = iter(jax.random.split(key, 64))

    def w(shape):
        return std * jax.random.normal(next(keys), shape, dtype=jnp.float32)

    params = {
        "word_emb": w((VOCAB, HIDDEN)),
        "pos_emb": w((SEQ, HIDDEN)),
        "type_emb": w((TYPE_VOCAB, HIDDEN)),
        "emb_ln_g": jnp.ones((1, HIDDEN), jnp.float32),
        "emb_ln_b": jnp.zeros((1, HIDDEN), jnp.float32),
        "dense_w": w((HIDDEN, HIDDEN)),              # SimCSE head: nn.Linear(H, H)
        "dense_b": jnp.zeros((1, HIDDEN), jnp.float32),
        "layers": [],
    }
    for _ in range(NUM_LAYERS):
        params["layers"].append({
            "wq": w((HIDDEN, HIDDEN)), "bq": jnp.zeros((1, HIDDEN), jnp.float32),
            "wk": w((HIDDEN, HIDDEN)), "bk": jnp.zeros((1, HIDDEN), jnp.float32),
            "wv": w((HIDDEN, HIDDEN)), "bv": jnp.zeros((1, HIDDEN), jnp.float32),
            "wo": w((HIDDEN, HIDDEN)), "bo": jnp.zeros((1, HIDDEN), jnp.float32),
            "ln1_g": jnp.ones((1, HIDDEN), jnp.float32),
            "ln1_b": jnp.zeros((1, HIDDEN), jnp.float32),
            "w1": w((HIDDEN, FFN)), "b1": jnp.zeros((1, FFN), jnp.float32),
            "w2": w((FFN, HIDDEN)), "b2": jnp.zeros((1, HIDDEN), jnp.float32),
            "ln2_g": jnp.ones((1, HIDDEN), jnp.float32),
            "ln2_b": jnp.zeros((1, HIDDEN), jnp.float32),
        })
    return params


def prepare_packed_params(params, batch, seq):
    """Pack + lane-pad all weights into 3 slabs.  Done ONCE at init (not per call)."""
    # --- constant slab: [word+type emb table | tiled pos emb | dense_w | misc rows] ---
    const = jnp.zeros((CONST_ROWS, HP), jnp.float32)
    const = const.at[:VOCAB, :HIDDEN].set(params["word_emb"])
    const = const.at[VOCAB_PAD:VOCAB_PAD + TYPE_VOCAB, :HIDDEN].set(params["type_emb"])
    pos_tiled = jnp.tile(params["pos_emb"][:seq], (batch, 1))            # (B*S, H)
    const = const.at[POS_OFF:POS_OFF + batch * seq, :HIDDEN].set(pos_tiled)
    const = const.at[DW_OFF:DW_OFF + HIDDEN, :HIDDEN].set(params["dense_w"])
    const = const.at[MISC_OFF + 0, :HIDDEN].set(params["dense_b"][0])
    const = const.at[MISC_OFF + 1, :HIDDEN].set(params["emb_ln_g"][0])
    const = const.at[MISC_OFF + 2, :HIDDEN].set(params["emb_ln_b"][0])

    # --- per-layer weight slab (L, 128, 1280) and vector slab (L, 8, 768) ---
    w_layers, v_layers = [], []
    for lp in params["layers"]:
        w = jnp.zeros((HP, W_COLS), jnp.float32)
        v = jnp.zeros((8, QKV_W), jnp.float32)
        for h in range(NUM_HEADS):
            base = 3 * DHP * h
            w = w.at[:HIDDEN, base:base + D_HEAD].set(lp["wq"][:, h * D_HEAD:(h + 1) * D_HEAD])
            w = w.at[:HIDDEN, base + DHP:base + DHP + D_HEAD].set(lp["wk"][:, h * D_HEAD:(h + 1) * D_HEAD])
            w = w.at[:HIDDEN, base + 2 * DHP:base + 2 * DHP + D_HEAD].set(lp["wv"][:, h * D_HEAD:(h + 1) * D_HEAD])
            v = v.at[0, base:base + D_HEAD].set(lp["bq"][0, h * D_HEAD:(h + 1) * D_HEAD])
            v = v.at[0, base + DHP:base + DHP + D_HEAD].set(lp["bk"][0, h * D_HEAD:(h + 1) * D_HEAD])
            v = v.at[0, base + 2 * DHP:base + 2 * DHP + D_HEAD].set(lp["bv"][0, h * D_HEAD:(h + 1) * D_HEAD])
            # per-head slice of Wo (rows = padded d_head, cols = padded hidden)
            w = w.at[:D_HEAD, WO_OFF + h * DHP:WO_OFF + h * DHP + HIDDEN].set(
                lp["wo"][h * D_HEAD:(h + 1) * D_HEAD, :])
        w = w.at[:HIDDEN, W1_OFF:W1_OFF + FFN].set(lp["w1"])
        w = w.at[:FFN, W2_OFF:W2_OFF + HIDDEN].set(lp["w2"])
        v = v.at[1, :HIDDEN].set(lp["bo"][0])
        v = v.at[2, :HIDDEN].set(lp["ln1_g"][0])
        v = v.at[3, :HIDDEN].set(lp["ln1_b"][0])
        v = v.at[4, :FFN].set(lp["b1"][0])
        v = v.at[5, :HIDDEN].set(lp["b2"][0])
        v = v.at[6, :HIDDEN].set(lp["ln2_g"][0])
        v = v.at[7, :HIDDEN].set(lp["ln2_b"][0])
        w_layers.append(w)
        v_layers.append(v)

    return {"const": const,
            "w": jnp.stack(w_layers, axis=0),          # (L, 128, 1280)
            "vec": jnp.stack(v_layers, axis=0)}        # (L, 8, 768)


# ----------------------------------- main -----------------------------------
if __name__ == "__main__":
    key = jax.random.PRNGKey(0)
    k_param, k_ids = jax.random.split(key)

    params = init_params(k_param)
    packed = prepare_packed_params(params, BATCH, SEQ)   # once, outside the call path

    input_ids = jax.random.randint(k_ids, (BATCH, SEQ), 0, VOCAB, dtype=jnp.int32)
    attention_mask = jnp.array(
        [[1, 1, 1, 1, 1, 1, 1, 1],
         [1, 1, 1, 1, 1, 1, 0, 0]], dtype=jnp.float32)
    token_type_ids = jnp.zeros((BATCH, SEQ), jnp.int32)

    emb = simcse_forward(packed, input_ids, attention_mask, token_type_ids,
                         training=True)
    emb = jax.block_until_ready(emb)
    assert emb.shape == (BATCH, HIDDEN) and emb.dtype == jnp.float32
    print("KERNEL_OK")
</pallas_src>

<mosaic_0001>
module attributes {stable_mosaic.version = 11 : i64} {
  func.func @fused_forward_kernel(%arg0: memref<2x16x1xi32, #tpu.memory_space<vmem>>, %arg1: memref<2x8xf32, #tpu.memory_space<vmem>>, %arg2: memref<408x128xf32, #tpu.memory_space<vmem>>, %arg3: memref<2x128x1280xf32, #tpu.memory_space<vmem>>, %arg4: memref<2x8x768xf32, #tpu.memory_space<vmem>>, %arg5: memref<2x128xf32, #tpu.memory_space<vmem>>) attributes {dimension_semantics = [], scalar_prefetch = 0 : i64, scratch_operands = 0 : i64, tpu.core_type = #tpu.core_type<tc>} {
    %0 = tpu.iota {dimensions = array<i32: 1>} : vector<1x128xi32>
    %c32_i32 = arith.constant 32 : i32
    %1 = vector.broadcast %c32_i32 : i32 to vector<1x128xi32>
    %2 = arith.cmpi slt, %0, %1 : vector<1x128xi32>
    %3 = arith.extui %2 : vector<1x128xi1> to vector<1x128xi32>
    %4 = arith.sitofp %3 : vector<1x128xi32> to vector<1x128xf32>
    %c0 = arith.constant 0 : index
    %c0_0 = arith.constant 0 : index
    %c0_1 = arith.constant 0 : index
    %5 = vector.load %arg0[%c0, %c0_0, %c0_1] : memref<2x16x1xi32, #tpu.memory_space<vmem>>, vector<1x16x1xi32>
    %6 = vector.shape_cast %5 : vector<1x16x1xi32> to vector<16x1xi32>
    %c1 = arith.constant 1 : index
    %c0_2 = arith.constant 0 : index
    %c0_3 = arith.constant 0 : index
    %7 = vector.load %arg0[%c1, %c0_2, %c0_3] : memref<2x16x1xi32, #tpu.memory_space<vmem>>, vector<1x16x1xi32>
    %8 = vector.shape_cast %7 : vector<1x16x1xi32> to vector<16x1xi32>
    %c128_i32 = arith.constant 128 : i32
    %9 = vector.broadcast %c128_i32 : i32 to vector<16x1xi32>
    %10 = arith.addi %8, %9 : vector<16x1xi32>
    %11 = tpu.iota {dimensions = array<i32: 1>} : vector<16x256xi32>
    %12 = vector.broadcast %6 : vector<16x1xi32> to vector<16x256xi32>
    %13 = arith.cmpi eq, %11, %12 : vector<16x256xi32>
    %14 = vector.broadcast %10 : vector<16x1xi32> to vector<16x256xi32>
    %15 = arith.cmpi eq, %11, %14 : vector<16x256xi32>
    %16 = arith.ori %13, %15 : vector<16x256xi1>
    %17 = arith.extui %16 : vector<16x256xi1> to vector<16x256xi32>
    %18 = arith.sitofp %17 : vector<16x256xi32> to vector<16x256xf32>
    %c0_4 = arith.constant 0 : index
    %c0_5 = arith.constant 0 : index
    %19 = vector.load %arg2[%c0_4, %c0_5] : memref<408x128xf32, #tpu.memory_space<vmem>>, vector<256x128xf32>
    %cst = arith.constant dense<0.000000e+00> : vector<16x128xf32>
    %20 = tpu.matmul %18, %19, %cst {dimension_numbers = #tpu.dot_dimension_numbers<[1], [0], [0], [1], [0, 0, 1, 1], [], []>} : vector<16x256xf32>, vector<256x128xf32>, vector<16x128xf32> -> vector<16x128xf32>
    %c256 = arith.constant 256 : index
    %c0_6 = arith.constant 0 : index
    %21 = vector.load %arg2[%c256, %c0_6] : memref<408x128xf32, #tpu.memory_space<vmem>>, vector<16x128xf32>
    %22 = arith.addf %20, %21 : vector<16x128xf32>
    %c400 = arith.constant 400 : index
    %c0_7 = arith.constant 0 : index
    %23 = vector.load %arg2[%c400, %c0_7] : memref<408x128xf32, #tpu.memory_space<vmem>>, vector<8x128xf32>
    %24 = vector.extract_strided_slice %23 {offsets = [1, 0], sizes = [1, 128], strides = [1, 1]} : vector<8x128xf32> to vector<1x128xf32>
    %25 = vector.extract_strided_slice %23 {offsets = [2, 0], sizes = [1, 128], strides = [1, 1]} : vector<8x128xf32> to vector<1x128xf32>
    %26 = vector.broadcast %4 : vector<1x128xf32> to vector<16x128xf32>
    %27 = arith.mulf %22, %26 : vector<16x128xf32>
    %cst_8 = arith.constant dense<0.000000e+00> : vector<16xf32>
    %28 = vector.multi_reduction <add>, %27, %cst_8 [1] : vector<16x128xf32> to vector<16xf32>
    %29 = vector.shape_cast %28 : vector<16xf32> to vector<16x1xf32>
    %cst_9 = arith.constant 3.125000e-02 : f32
    %30 = vector.broadcast %cst_9 : f32 to vector<16x1xf32>
    %31 = arith.mulf %29, %30 : vector<16x1xf32>
    %32 = vector.broadcast %31 : vector<16x1xf32> to vector<16x128xf32>
    %33 = arith.subf %22, %32 : vector<16x128xf32>
    %34 = vector.broadcast %4 : vector<1x128xf32> to vector<16x128xf32>
    %35 = arith.mulf %33, %34 : vector<16x128xf32>
    %36 = arith.mulf %35, %35 : vector<16x128xf32>
    %cst_10 = arith.constant dense<0.000000e+00> : vector<16xf32>
    %37 = vector.multi_reduction <add>, %36, %cst_10 [1] : vector<16x128xf32> to vector<16xf32>
    %38 = vector.shape_cast %37 : vector<16xf32> to vector<16x1xf32>
    %cst_11 = arith.constant 3.125000e-02 : f32
    %39 = vector.broadcast %cst_11 : f32 to vector<16x1xf32>
    %40 = arith.mulf %38, %39 : vector<16x1xf32>
    %cst_12 = arith.constant 9.99999996E-13 : f32
    %41 = vector.broadcast %cst_12 : f32 to vector<16x1xf32>
    %42 = arith.addf %40, %41 : vector<16x1xf32>
    %43 = math.rsqrt %42 : vector<16x1xf32>
    %44 = vector.broadcast %43 : vector<16x1xf32> to vector<16x128xf32>
    %45 = arith.mulf %35, %44 : vector<16x128xf32>
    %46 = vector.broadcast %24 : vector<1x128xf32> to vector<16x128xf32>
    %47 = arith.mulf %45, %46 : vector<16x128xf32>
    %48 = vector.broadcast %25 : vector<1x128xf32> to vector<16x128xf32>
    %49 = arith.addf %47, %48 : vector<16x128xf32>
    %c0_13 = arith.constant 0 : index
    %c0_14 = arith.constant 0 : index
    %50 = vector.load %arg1[%c0_13, %c0_14] : memref<2x8xf32, #tpu.memory_space<vmem>>, vector<2x8xf32>
    %cst_15 = arith.constant 1.000000e+00 : f32
    %51 = vector.broadcast %cst_15 : f32 to vector<2x8xf32>
    %52 = arith.subf %50, %51 : vector<2x8xf32>
    %cst_16 = arith.constant 1.000000e+09 : f32
    %53 = vector.broadcast %cst_16 : f32 to vector<2x8xf32>
    %54 = arith.mulf %52, %53 : vector<2x8xf32>
    %55 = vector.shape_cast %54 : vector<2x8xf32> to vector<2x1x8xf32>
    %c0_17 = arith.constant 0 : index
    %c0_18 = arith.constant 0 : index
    %c0_19 = arith.constant 0 : index
    %56 = vector.load %arg4[%c0_17, %c0_18, %c0_19] : memref<2x8x768xf32, #tpu.memory_space<vmem>>, vector<1x8x768xf32>
    %57 = vector.shape_cast %56 : vector<1x8x768xf32> to vector<8x768xf32>
    %c0_20 = arith.constant 0 : index
    %c0_21 = arith.constant 0 : index
    %c0_22 = arith.constant 0 : index
    %58 = vector.load %arg3[%c0_20, %c0_21, %c0_22] : memref<2x128x1280xf32, #tpu.memory_space<vmem>>, vector<1x128x768xf32>
    %59 = vector.shape_cast %58 : vector<1x128x768xf32> to vector<128x768xf32>
    %cst_23 = arith.constant dense<0.000000e+00> : vector<16x768xf32>
    %60 = tpu.matmul %49, %59, %cst_23 {dimension_numbers = #tpu.dot_dimension_numbers<[1], [0], [0], [1], [0, 0, 1, 1], [], []>} : vector<16x128xf32>, vector<128x768xf32>, vector<16x768xf32> -> vector<16x768xf32>
    %61 = vector.extract_strided_slice %57 {offsets = [0, 0], sizes = [1, 768], strides = [1, 1]} : vector<8x768xf32> to vector<1x768xf32>
    %62 = vector.broadcast %61 : vector<1x768xf32> to vector<16x768xf32>
    %63 = arith.addf %60, %62 : vector<16x768xf32>
    %64 = vector.extract_strided_slice %57 {offsets = [1, 0], sizes = [1, 128], strides = [1, 1]} : vector<8x768xf32> to vector<1x128xf32>
    %65 = vector.extract_strided_slice %63 {offsets = [0, 0], sizes = [16, 128], strides = [1, 1]} : vector<16x768xf32> to vector<16x128xf32>
    %66 = vector.shape_cast %65 : vector<16x128xf32> to vector<2x8x128xf32>
    %67 = vector.extract_strided_slice %63 {offsets = [0, 128], sizes = [16, 128], strides = [1, 1]} : vector<16x768xf32> to vector<16x128xf32>
    %68 = vector.shape_cast %67 : vector<16x128xf32> to vector<2x8x128xf32>
    %69 = vector.extract_strided_slice %63 {offsets = [0, 256], sizes = [16, 128], strides = [1, 1]} : vector<16x768xf32> to vector<16x128xf32>
    %70 = vector.shape_cast %69 : vector<16x128xf32> to vector<2x8x128xf32>
    "tpu.trace_start"() <{level = 10 : i32, message = "bqd,bkd->bqk"}> : () -> ()
    %cst_24 = arith.constant dense<0.000000e+00> : vector<2x8x8xf32>
    %71 = tpu.matmul %66, %68, %cst_24 {dimension_numbers = #tpu.dot_dimension_numbers<[2], [2], [1], [1], [0, 0, 0, 1, 1, 1], [0], [0]>} : vector<2x8x128xf32>, vector<2x8x128xf32>, vector<2x8x8xf32> -> vector<2x8x8xf32>
    "tpu.trace_stop"() : () -> ()
    %cst_25 = arith.constant 2.500000e-01 : f32
    %72 = vector.broadcast %cst_25 : f32 to vector<2x8x8xf32>
    %73 = arith.mulf %71, %72 : vector<2x8x8xf32>
    %74 = vector.broadcast %55 : vector<2x1x8xf32> to vector<2x8x8xf32>
    %75 = arith.addf %73, %74 : vector<2x8x8xf32>
    %cst_26 = arith.constant dense<0xFF800000> : vector<2x8xf32>
    %76 = vector.multi_reduction <maximumf>, %75, %cst_26 [2] : vector<2x8x8xf32> to vector<2x8xf32>
    %77 = vector.shape_cast %76 : vector<2x8xf32> to vector<2x8x1xf32>
    %78 = vector.broadcast %77 : vector<2x8x1xf32> to vector<2x8x8xf32>
    %79 = arith.subf %75, %78 : vector<2x8x8xf32>
    %80 = math.exp %79 : vector<2x8x8xf32>
    %cst_27 = arith.constant dense<0.000000e+00> : vector<2x8xf32>
    %81 = vector.multi_reduction <add>, %80, %cst_27 [2] : vector<2x8x8xf32> to vector<2x8xf32>
    %82 = vector.shape_cast %81 : vector<2x8xf32> to vector<2x8x1xf32>
    %83 = tpu.reciprocal %82 {approx = true} : vector<2x8x1xf32> -> vector<2x8x1xf32>
    %84 = vector.broadcast %83 : vector<2x8x1xf32> to vector<2x8x8xf32>
    %85 = arith.mulf %80, %84 : vector<2x8x8xf32>
    "tpu.trace_start"() <{level = 10 : i32, message = "bqk,bkd->bqd"}> : () -> ()
    %cst_28 = arith.constant dense<0.000000e+00> : vector<2x8x128xf32>
    %86 = tpu.matmul %85, %70, %cst_28 {dimension_numbers = #tpu.dot_dimension_numbers<[2], [1], [1], [2], [0, 0, 0, 1, 1, 2], [0], [0]>} : vector<2x8x8xf32>, vector<2x8x128xf32>, vector<2x8x128xf32> -> vector<2x8x128xf32>
    "tpu.trace_stop"() : () -> ()
    %87 = vector.shape_cast %86 : vector<2x8x128xf32> to vector<16x128xf32>
    %c0_29 = arith.constant 0 : index
    %c0_30 = arith.constant 0 : index
    %c768 = arith.constant 768 : index
    %88 = vector.load %arg3[%c0_29, %c0_30, %c768] : memref<2x128x1280xf32, #tpu.memory_space<vmem>>, vector<1x128x128xf32>
    %89 = vector.shape_cast %88 : vector<1x128x128xf32> to vector<128x128xf32>
    %cst_31 = arith.constant dense<0.000000e+00> : vector<16x128xf32>
    %90 = tpu.matmul %87, %89, %cst_31 {dimension_numbers = #tpu.dot_dimension_numbers<[1], [0], [0], [1], [0, 0, 1, 1], [], []>} : vector<16x128xf32>, vector<128x128xf32>, vector<16x128xf32> -> vector<16x128xf32>
    %91 = vector.broadcast %64 : vector<1x128xf32> to vector<16x128xf32>
    %92 = arith.addf %91, %90 : vector<16x128xf32>
    %93 = vector.extract_strided_slice %63 {offsets = [0, 384], sizes = [16, 128], strides = [1, 1]} : vector<16x768xf32> to vector<16x128xf32>
    %94 = vector.shape_cast %93 : vector<16x128xf32> to vector<2x8x128xf32>
    %95 = vector.extract_strided_slice %63 {offsets = [0, 512], sizes = [16, 128], strides = [1, 1]} : vector<16x768xf32> to vector<16x128xf32>
    %96 = vector.shape_cast %95 : vector<16x128xf32> to vector<2x8x128xf32>
    %97 = vector.extract_strided_slice %63 {offsets = [0, 640], sizes = [16, 128], strides = [1, 1]} : vector<16x768xf32> to vector<16x128xf32>
    %98 = vector.shape_cast %97 : vector<16x128xf32> to vector<2x8x128xf32>
    "tpu.trace_start"() <{level = 10 : i32, message = "bqd,bkd->bqk"}> : () -> ()
    %cst_32 = arith.constant dense<0.000000e+00> : vector<2x8x8xf32>
    %99 = tpu.matmul %94, %96, %cst_32 {dimension_numbers = #tpu.dot_dimension_numbers<[2], [2], [1], [1], [0, 0, 0, 1, 1, 1], [0], [0]>} : vector<2x8x128xf32>, vector<2x8x128xf32>, vector<2x8x8xf32> -> vector<2x8x8xf32>
    "tpu.trace_stop"() : () -> ()
    %cst_33 = arith.constant 2.500000e-01 : f32
    %100 = vector.broadcast %cst_33 : f32 to vector<2x8x8xf32>
    %101 = arith.mulf %99, %100 : vector<2x8x8xf32>
    %102 = vector.broadcast %55 : vector<2x1x8xf32> to vector<2x8x8xf32>
    %103 = arith.addf %101, %102 : vector<2x8x8xf32>
    %cst_34 = arith.constant dense<0xFF800000> : vector<2x8xf32>
    %104 = vector.multi_reduction <maximumf>, %103, %cst_34 [2] : vector<2x8x8xf32> to vector<2x8xf32>
    %105 = vector.shape_cast %104 : vector<2x8xf32> to vector<2x8x1xf32>
    %106 = vector.broadcast %105 : vector<2x8x1xf32> to vector<2x8x8xf32>
    %107 = arith.subf %103, %106 : vector<2x8x8xf32>
    %108 = math.exp %107 : vector<2x8x8xf32>
    %cst_35 = arith.constant dense<0.000000e+00> : vector<2x8xf32>
    %109 = vector.multi_reduction <add>, %108, %cst_35 [2] : vector<2x8x8xf32> to vector<2x8xf32>
    %110 = vector.shape_cast %109 : vector<2x8xf32> to vector<2x8x1xf32>
    %111 = tpu.reciprocal %110 {approx = true} : vector<2x8x1xf32> -> vector<2x8x1xf32>
    %112 = vector.broadcast %111 : vector<2x8x1xf32> to vector<2x8x8xf32>
    %113 = arith.mulf %108, %112 : vector<2x8x8xf32>
    "tpu.trace_start"() <{level = 10 : i32, message = "bqk,bkd->bqd"}> : () -> ()
    %cst_36 = arith.constant dense<0.000000e+00> : vector<2x8x128xf32>
    %114 = tpu.matmul %113, %98, %cst_36 {dimension_numbers = #tpu.dot_dimension_numbers<[2], [1], [1], [2], [0, 0, 0, 1, 1, 2], [0], [0]>} : vector<2x8x8xf32>, vector<2x8x128xf32>, vector<2x8x128xf32> -> vector<2x8x128xf32>
    "tpu.trace_stop"() : () -> ()
    %115 = vector.shape_cast %114 : vector<2x8x128xf32> to vector<16x128xf32>
    %c0_37 = arith.constant 0 : index
    %c0_38 = arith.constant 0 : index
    %c896 = arith.constant 896 : index
    %116 = vector.load %arg3[%c0_37, %c0_38, %c896] : memref<2x128x1280xf32, #tpu.memory_space<vmem>>, vector<1x128x128xf32>
    %117 = vector.shape_cast %116 : vector<1x128x128xf32> to vector<128x128xf32>
    %cst_39 = arith.constant dense<0.000000e+00> : vector<16x128xf32>
    %118 = tpu.matmul %115, %117, %cst_39 {dimension_numbers = #tpu.dot_dimension_numbers<[1], [0], [0], [1], [0, 0, 1, 1], [], []>} : vector<16x128xf32>, vector<128x128xf32>, vector<16x128xf32> -> vector<16x128xf32>
    %119 = arith.addf %92, %118 : vector<16x128xf32>
    %120 = arith.addf %49, %119 : vector<16x128xf32>
    %121 = vector.extract_strided_slice %57 {offsets = [2, 0], sizes = [1, 128], strides = [1, 1]} : vector<8x768xf32> to vector<1x128xf32>
    %122 = vector.extract_strided_slice %57 {offsets = [3, 0], sizes = [1, 128], strides = [1, 1]} : vector<8x768xf32> to vector<1x128xf32>
    %123 = vector.broadcast %4 : vector<1x128xf32> to vector<16x128xf32>
    %124 = arith.mulf %120, %123 : vector<16x128xf32>
    %cst_40 = arith.constant dense<0.000000e+00> : vector<16xf32>
    %125 = vector.multi_reduction <add>, %124, %cst_40 [1] : vector<16x128xf32> to vector<16xf32>
    %126 = vector.shape_cast %125 : vector<16xf32> to vector<16x1xf32>
    %cst_41 = arith.constant 3.125000e-02 : f32
    %127 = vector.broadcast %cst_41 : f32 to vector<16x1xf32>
    %128 = arith.mulf %126, %127 : vector<16x1xf32>
    %129 = vector.broadcast %128 : vector<16x1xf32> to vector<16x128xf32>
    %130 = arith.subf %120, %129 : vector<16x128xf32>
    %131 = vector.broadcast %4 : vector<1x128xf32> to vector<16x128xf32>
    %132 = arith.mulf %130, %131 : vector<16x128xf32>
    %133 = arith.mulf %132, %132 : vector<16x128xf32>
    %cst_42 = arith.constant dense<0.000000e+00> : vector<16xf32>
    %134 = vector.multi_reduction <add>, %133, %cst_42 [1] : vector<16x128xf32> to vector<16xf32>
    %135 = vector.shape_cast %134 : vector<16xf32> to vector<16x1xf32>
    %cst_43 = arith.constant 3.125000e-02 : f32
    %136 = vector.broadcast %cst_43 : f32 to vector<16x1xf32>
    %137 = arith.mulf %135, %136 : vector<16x1xf32>
    %cst_44 = arith.constant 9.99999996E-13 : f32
    %138 = vector.broadcast %cst_44 : f32 to vector<16x1xf32>
    %139 = arith.addf %137, %138 : vector<16x1xf32>
    %140 = math.rsqrt %139 : vector<16x1xf32>
    %141 = vector.broadcast %140 : vector<16x1xf32> to vector<16x128xf32>
    %142 = arith.mulf %132, %141 : vector<16x128xf32>
    %143 = vector.broadcast %121 : vector<1x128xf32> to vector<16x128xf32>
    %144 = arith.mulf %142, %143 : vector<16x128xf32>
    %145 = vector.broadcast %122 : vector<1x128xf32> to vector<16x128xf32>
    %146 = arith.addf %144, %145 : vector<16x128xf32>
    %c0_45 = arith.constant 0 : index
    %c0_46 = arith.constant 0 : index
    %c1024 = arith.constant 1024 : index
    %147 = vector.load %arg3[%c0_45, %c0_46, %c1024] : memref<2x128x1280xf32, #tpu.memory_space<vmem>>, vector<1x128x128xf32>
    %148 = vector.shape_cast %147 : vector<1x128x128xf32> to vector<128x128xf32>
    %cst_47 = arith.constant dense<0.000000e+00> : vector<16x128xf32>
    %149 = tpu.matmul %146, %148, %cst_47 {dimension_numbers = #tpu.dot_dimension_numbers<[1], [0], [0], [1], [0, 0, 1, 1], [], []>} : vector<16x128xf32>, vector<128x128xf32>, vector<16x128xf32> -> vector<16x128xf32>
    %150 = vector.extract_strided_slice %57 {offsets = [4, 0], sizes = [1, 128], strides = [1, 1]} : vector<8x768xf32> to vector<1x128xf32>
    %151 = vector.broadcast %150 : vector<1x128xf32> to vector<16x128xf32>
    %152 = arith.addf %149, %151 : vector<16x128xf32>
    %cst_48 = arith.constant 5.000000e-01 : f32
    %153 = vector.broadcast %cst_48 : f32 to vector<16x128xf32>
    %154 = arith.mulf %153, %152 : vector<16x128xf32>
    %cst_49 = arith.constant 4.471500e-02 : f32
    %155 = vector.broadcast %cst_49 : f32 to vector<16x128xf32>
    %156 = arith.mulf %155, %152 : vector<16x128xf32>
    %157 = arith.mulf %156, %152 : vector<16x128xf32>
    %158 = arith.mulf %157, %152 : vector<16x128xf32>
    %159 = arith.addf %152, %158 : vector<16x128xf32>
    %cst_50 = arith.constant 0.797884583 : f32
    %160 = vector.broadcast %cst_50 : f32 to vector<16x128xf32>
    %161 = arith.mulf %160, %159 : vector<16x128xf32>
    %162 = math.tanh %161 : vector<16x128xf32>
    %cst_51 = arith.constant 1.000000e+00 : f32
    %163 = vector.broadcast %cst_51 : f32 to vector<16x128xf32>
    %164 = arith.addf %163, %162 : vector<16x128xf32>
    %165 = arith.mulf %154, %164 : vector<16x128xf32>
    %c0_52 = arith.constant 0 : index
    %c0_53 = arith.constant 0 : index
    %c1152 = arith.constant 1152 : index
    %166 = vector.load %arg3[%c0_52, %c0_53, %c1152] : memref<2x128x1280xf32, #tpu.memory_space<vmem>>, vector<1x128x128xf32>
    %167 = vector.shape_cast %166 : vector<1x128x128xf32> to vector<128x128xf32>
    %cst_54 = arith.constant dense<0.000000e+00> : vector<16x128xf32>
    %168 = tpu.matmul %165, %167, %cst_54 {dimension_numbers = #tpu.dot_dimension_numbers<[1], [0], [0], [1], [0, 0, 1, 1], [], []>} : vector<16x128xf32>, vector<128x128xf32>, vector<16x128xf32> -> vector<16x128xf32>
    %169 = vector.extract_strided_slice %57 {offsets = [5, 0], sizes = [1, 128], strides = [1, 1]} : vector<8x768xf32> to vector<1x128xf32>
    %170 = vector.broadcast %169 : vector<1x128xf32> to vector<16x128xf32>
    %171 = arith.addf %168, %170 : vector<16x128xf32>
    %172 = arith.addf %146, %171 : vector<16x128xf32>
    %173 = vector.extract_strided_slice %57 {offsets = [6, 0], sizes = [1, 128], strides = [1, 1]} : vector<8x768xf32> to vector<1x128xf32>
    %174 = vector.extract_strided_slice %57 {offsets = [7, 0], sizes = [1, 128], strides = [1, 1]} : vector<8x768xf32> to vector<1x128xf32>
    %175 = vector.broadcast %4 : vector<1x128xf32> to vector<16x128xf32>
    %176 = arith.mulf %172, %175 : vector<16x128xf32>
    %cst_55 = arith.constant dense<0.000000e+00> : vector<16xf32>
    %177 = vector.multi_reduction <add>, %176, %cst_55 [1] : vector<16x128xf32> to vector<16xf32>
    %178 = vector.shape_cast %177 : vector<16xf32> to vector<16x1xf32>
    %cst_56 = arith.constant 3.125000e-02 : f32
    %179 = vector.broadcast %cst_56 : f32 to vector<16x1xf32>
    %180 = arith.mulf %178, %179 : vector<16x1xf32>
    %181 = vector.broadcast %180 : vector<16x1xf32> to vector<16x128xf32>
    %182 = arith.subf %172, %181 : vector<16x128xf32>
    %183 = vector.broadcast %4 : vector<1x128xf32> to vector<16x128xf32>
    %184 = arith.mulf %182, %183 : vector<16x128xf32>
    %185 = arith.mulf %184, %184 : vector<16x128xf32>
    %cst_57 = arith.constant dense<0.000000e+00> : vector<16xf32>
    %186 = vector.multi_reduction <add>, %185, %cst_57 [1] : vector<16x128xf32> to vector<16xf32>
    %187 = vector.shape_cast %186 : vector<16xf32> to vector<16x1xf32>
    %cst_58 = arith.constant 3.125000e-02 : f32
    %188 = vector.broadcast %cst_58 : f32 to vector<16x1xf32>
    %189 = arith.mulf %187, %188 : vector<16x1xf32>
    %cst_59 = arith.constant 9.99999996E-13 : f32
    %190 = vector.broadcast %cst_59 : f32 to vector<16x1xf32>
    %191 = arith.addf %189, %190 : vector<16x1xf32>
    %192 = math.rsqrt %191 : vector<16x1xf32>
    %193 = vector.broadcast %192 : vector<16x1xf32> to vector<16x128xf32>
    %194 = arith.mulf %184, %193 : vector<16x128xf32>
    %195 = vector.broadcast %173 : vector<1x128xf32> to vector<16x128xf32>
    %196 = arith.mulf %194, %195 : vector<16x128xf32>
    %197 = vector.broadcast %174 : vector<1x128xf32> to vector<16x128xf32>
    %198 = arith.addf %196, %197 : vector<16x128xf32>
    %c1_60 = arith.constant 1 : index
    %c0_61 = arith.constant 0 : index
    %c0_62 = arith.constant 0 : index
    %199 = vector.load %arg4[%c1_60, %c0_61, %c0_62] : memref<2x8x768xf32, #tpu.memory_space<vmem>>, vector<1x8x768xf32>
    %200 = vector.shape_cast %199 : vector<1x8x768xf32> to vector<8x768xf32>
    %c1_63 = arith.constant 1 : index
    %c0_64 = arith.constant 0 : index
    %c0_65 = arith.constant 0 : index
    %201 = vector.load %arg3[%c1_63, %c0_64, %c0_65] : memref<2x128x1280xf32, #tpu.memory_space<vmem>>, vector<1x128x768xf32>
    %202 = vector.shape_cast %201 : vector<1x128x768xf32> to vector<128x768xf32>
    %cst_66 = arith.constant dense<0.000000e+00> : vector<16x768xf32>
    %203 = tpu.matmul %198, %202, %cst_66 {dimension_numbers = #tpu.dot_dimension_numbers<[1], [0], [0], [1], [0, 0, 1, 1], [], []>} : vector<16x128xf32>, vector<128x768xf32>, vector<16x768xf32> -> vector<16x768xf32>
    %204 = vector.extract_strided_slice %200 {offsets = [0, 0], sizes = [1, 768], strides = [1, 1]} : vector<8x768xf32> to vector<1x768xf32>
    %205 = vector.broadcast %204 : vector<1x768xf32> to vector<16x768xf32>
    %206 = arith.addf %203, %205 : vector<16x768xf32>
    %207 = vector.extract_strided_slice %200 {offsets = [1, 0], sizes = [1, 128], strides = [1, 1]} : vector<8x768xf32> to vector<1x128xf32>
    %208 = vector.extract_strided_slice %206 {offsets = [0, 0], sizes = [16, 128], strides = [1, 1]} : vector<16x768xf32> to vector<16x128xf32>
    %209 = vector.shape_cast %208 : vector<16x128xf32> to vector<2x8x128xf32>
    %210 = vector.extract_strided_slice %206 {offsets = [0, 128], sizes = [16, 128], strides = [1, 1]} : vector<16x768xf32> to vector<16x128xf32>
    %211 = vector.shape_cast %210 : vector<16x128xf32> to vector<2x8x128xf32>
    %212 = vector.extract_strided_slice %206 {offsets = [0, 256], sizes = [16, 128], strides = [1, 1]} : vector<16x768xf32> to vector<16x128xf32>
    %213 = vector.shape_cast %212 : vector<16x128xf32> to vector<2x8x128xf32>
    "tpu.trace_start"() <{level = 10 : i32, message = "bqd,bkd->bqk"}> : () -> ()
    %cst_67 = arith.constant dense<0.000000e+00> : vector<2x8x8xf32>
    %214 = tpu.matmul %209, %211, %cst_67 {dimension_numbers = #tpu.dot_dimension_numbers<[2], [2], [1], [1], [0, 0, 0, 1, 1, 1], [0], [0]>} : vector<2x8x128xf32>, vector<2x8x128xf32>, vector<2x8x8xf32> -> vector<2x8x8xf32>
    "tpu.trace_stop"() : () -> ()
    %cst_68 = arith.constant 2.500000e-01 : f32
    %215 = vector.broadcast %cst_68 : f32 to vector<2x8x8xf32>
    %216 = arith.mulf %214, %215 : vector<2x8x8xf32>
    %217 = vector.broadcast %55 : vector<2x1x8xf32> to vector<2x8x8xf32>
    %218 = arith.addf %216, %217 : vector<2x8x8xf32>
    %cst_69 = arith.constant dense<0xFF800000> : vector<2x8xf32>
    %219 = vector.multi_reduction <maximumf>, %218, %cst_69 [2] : vector<2x8x8xf32> to vector<2x8xf32>
    %220 = vector.shape_cast %219 : vector<2x8xf32> to vector<2x8x1xf32>
    %221 = vector.broadcast %220 : vector<2x8x1xf32> to vector<2x8x8xf32>
    %222 = arith.subf %218, %221 : vector<2x8x8xf32>
    %223 = math.exp %222 : vector<2x8x8xf32>
    %cst_70 = arith.constant dense<0.000000e+00> : vector<2x8xf32>
    %224 = vector.multi_reduction <add>, %223, %cst_70 [2] : vector<2x8x8xf32> to vector<2x8xf32>
    %225 = vector.shape_cast %224 : vector<2x8xf32> to vector<2x8x1xf32>
    %226 = tpu.reciprocal %225 {approx = true} : vector<2x8x1xf32> -> vector<2x8x1xf32>
    %227 = vector.broadcast %226 : vector<2x8x1xf32> to vector<2x8x8xf32>
    %228 = arith.mulf %223, %227 : vector<2x8x8xf32>
    "tpu.trace_start"() <{level = 10 : i32, message = "bqk,bkd->bqd"}> : () -> ()
    %cst_71 = arith.constant dense<0.000000e+00> : vector<2x8x128xf32>
    %229 = tpu.matmul %228, %213, %cst_71 {dimension_numbers = #tpu.dot_dimension_numbers<[2], [1], [1], [2], [0, 0, 0, 1, 1, 2], [0], [0]>} : vector<2x8x8xf32>, vector<2x8x128xf32>, vector<2x8x128xf32> -> vector<2x8x128xf32>
    "tpu.trace_stop"() : () -> ()
    %230 = vector.shape_cast %229 : vector<2x8x128xf32> to vector<16x128xf32>
    %c1_72 = arith.constant 1 : index
    %c0_73 = arith.constant 0 : index
    %c768_74 = arith.constant 768 : index
    %231 = vector.load %arg3[%c1_72, %c0_73, %c768_74] : memref<2x128x1280xf32, #tpu.memory_space<vmem>>, vector<1x128x128xf32>
    %232 = vector.shape_cast %231 : vector<1x128x128xf32> to vector<128x128xf32>
    %cst_75 = arith.constant dense<0.000000e+00> : vector<16x128xf32>
    %233 = tpu.matmul %230, %232, %cst_75 {dimension_numbers = #tpu.dot_dimension_numbers<[1], [0], [0], [1], [0, 0, 1, 1], [], []>} : vector<16x128xf32>, vector<128x128xf32>, vector<16x128xf32> -> vector<16x128xf32>
    %234 = vector.broadcast %207 : vector<1x128xf32> to vector<16x128xf32>
    %235 = arith.addf %234, %233 : vector<16x128xf32>
    %236 = vector.extract_strided_slice %206 {offsets = [0, 384], sizes = [16, 128], strides = [1, 1]} : vector<16x768xf32> to vector<16x128xf32>
    %237 = vector.shape_cast %236 : vector<16x128xf32> to vector<2x8x128xf32>
    %238 = vector.extract_strided_slice %206 {offsets = [0, 512], sizes = [16, 128], strides = [1, 1]} : vector<16x768xf32> to vector<16x128xf32>
    %239 = vector.shape_cast %238 : vector<16x128xf32> to vector<2x8x128xf32>
    %240 = vector.extract_strided_slice %206 {offsets = [0, 640], sizes = [16, 128], strides = [1, 1]} : vector<16x768xf32> to vector<16x128xf32>
    %241 = vector.shape_cast %240 : vector<16x128xf32> to vector<2x8x128xf32>
    "tpu.trace_start"() <{level = 10 : i32, message = "bqd,bkd->bqk"}> : () -> ()
    %cst_76 = arith.constant dense<0.000000e+00> : vector<2x8x8xf32>
    %242 = tpu.matmul %237, %239, %cst_76 {dimension_numbers = #tpu.dot_dimension_numbers<[2], [2], [1], [1], [0, 0, 0, 1, 1, 1], [0], [0]>} : vector<2x8x128xf32>, vector<2x8x128xf32>, vector<2x8x8xf32> -> vector<2x8x8xf32>
    "tpu.trace_stop"() : () -> ()
    %cst_77 = arith.constant 2.500000e-01 : f32
    %243 = vector.broadcast %cst_77 : f32 to vector<2x8x8xf32>
    %244 = arith.mulf %242, %243 : vector<2x8x8xf32>
    %245 = vector.broadcast %55 : vector<2x1x8xf32> to vector<2x8x8xf32>
    %246 = arith.addf %244, %245 : vector<2x8x8xf32>
    %cst_78 = arith.constant dense<0xFF800000> : vector<2x8xf32>
    %247 = vector.multi_reduction <maximumf>, %246, %cst_78 [2] : vector<2x8x8xf32> to vector<2x8xf32>
    %248 = vector.shape_cast %247 : vector<2x8xf32> to vector<2x8x1xf32>
    %249 = vector.broadcast %248 : vector<2x8x1xf32> to vector<2x8x8xf32>
    %250 = arith.subf %246, %249 : vector<2x8x8xf32>
    %251 = math.exp %250 : vector<2x8x8xf32>
    %cst_79 = arith.constant dense<0.000000e+00> : vector<2x8xf32>
    %252 = vector.multi_reduction <add>, %251, %cst_79 [2] : vector<2x8x8xf32> to vector<2x8xf32>
    %253 = vector.shape_cast %252 : vector<2x8xf32> to vector<2x8x1xf32>
    %254 = tpu.reciprocal %253 {approx = true} : vector<2x8x1xf32> -> vector<2x8x1xf32>
    %255 = vector.broadcast %254 : vector<2x8x1xf32> to vector<2x8x8xf32>
    %256 = arith.mulf %251, %255 : vector<2x8x8xf32>
    "tpu.trace_start"() <{level = 10 : i32, message = "bqk,bkd->bqd"}> : () -> ()
    %cst_80 = arith.constant dense<0.000000e+00> : vector<2x8x128xf32>
    %257 = tpu.matmul %256, %241, %cst_80 {dimension_numbers = #tpu.dot_dimension_numbers<[2], [1], [1], [2], [0, 0, 0, 1, 1, 2], [0], [0]>} : vector<2x8x8xf32>, vector<2x8x128xf32>, vector<2x8x128xf32> -> vector<2x8x128xf32>
    "tpu.trace_stop"() : () -> ()
    %258 = vector.shape_cast %257 : vector<2x8x128xf32> to vector<16x128xf32>
    %c1_81 = arith.constant 1 : index
    %c0_82 = arith.constant 0 : index
    %c896_83 = arith.constant 896 : index
    %259 = vector.load %arg3[%c1_81, %c0_82, %c896_83] : memref<2x128x1280xf32, #tpu.memory_space<vmem>>, vector<1x128x128xf32>
    %260 = vector.shape_cast %259 : vector<1x128x128xf32> to vector<128x128xf32>
    %cst_84 = arith.constant dense<0.000000e+00> : vector<16x128xf32>
    %261 = tpu.matmul %258, %260, %cst_84 {dimension_numbers = #tpu.dot_dimension_numbers<[1], [0], [0], [1], [0, 0, 1, 1], [], []>} : vector<16x128xf32>, vector<128x128xf32>, vector<16x128xf32> -> vector<16x128xf32>
    %262 = arith.addf %235, %261 : vector<16x128xf32>
    %263 = arith.addf %198, %262 : vector<16x128xf32>
    %264 = vector.extract_strided_slice %200 {offsets = [2, 0], sizes = [1, 128], strides = [1, 1]} : vector<8x768xf32> to vector<1x128xf32>
    %265 = vector.extract_strided_slice %200 {offsets = [3, 0], sizes = [1, 128], strides = [1, 1]} : vector<8x768xf32> to vector<1x128xf32>
    %266 = vector.broadcast %4 : vector<1x128xf32> to vector<16x128xf32>
    %267 = arith.mulf %263, %266 : vector<16x128xf32>
    %cst_85 = arith.constant dense<0.000000e+00> : vector<16xf32>
    %268 = vector.multi_reduction <add>, %267, %cst_85 [1] : vector<16x128xf32> to vector<16xf32>
    %269 = vector.shape_cast %268 : vector<16xf32> to vector<16x1xf32>
    %cst_86 = arith.constant 3.125000e-02 : f32
    %270 = vector.broadcast %cst_86 : f32 to vector<16x1xf32>
    %271 = arith.mulf %269, %270 : vector<16x1xf32>
    %272 = vector.broadcast %271 : vector<16x1xf32> to vector<16x128xf32>
    %273 = arith.subf %263, %272 : vector<16x128xf32>
    %274 = vector.broadcast %4 : vector<1x128xf32> to vector<16x128xf32>
    %275 = arith.mulf %273, %274 : vector<16x128xf32>
    %276 = arith.mulf %275, %275 : vector<16x128xf32>
    %cst_87 = arith.constant dense<0.000000e+00> : vector<16xf32>
    %277 = vector.multi_reduction <add>, %276, %cst_87 [1] : vector<16x128xf32> to vector<16xf32>
    %278 = vector.shape_cast %277 : vector<16xf32> to vector<16x1xf32>
    %cst_88 = arith.constant 3.125000e-02 : f32
    %279 = vector.broadcast %cst_88 : f32 to vector<16x1xf32>
    %280 = arith.mulf %278, %279 : vector<16x1xf32>
    %cst_89 = arith.constant 9.99999996E-13 : f32
    %281 = vector.broadcast %cst_89 : f32 to vector<16x1xf32>
    %282 = arith.addf %280, %281 : vector<16x1xf32>
    %283 = math.rsqrt %282 : vector<16x1xf32>
    %284 = vector.broadcast %283 : vector<16x1xf32> to vector<16x128xf32>
    %285 = arith.mulf %275, %284 : vector<16x128xf32>
    %286 = vector.broadcast %264 : vector<1x128xf32> to vector<16x128xf32>
    %287 = arith.mulf %285, %286 : vector<16x128xf32>
    %288 = vector.broadcast %265 : vector<1x128xf32> to vector<16x128xf32>
    %289 = arith.addf %287, %288 : vector<16x128xf32>
    %c1_90 = arith.constant 1 : index
    %c0_91 = arith.constant 0 : index
    %c1024_92 = arith.constant 1024 : index
    %290 = vector.load %arg3[%c1_90, %c0_91, %c1024_92] : memref<2x128x1280xf32, #tpu.memory_space<vmem>>, vector<1x128x128xf32>
    %291 = vector.shape_cast %290 : vector<1x128x128xf32> to vector<128x128xf32>
    %cst_93 = arith.constant dense<0.000000e+00> : vector<16x128xf32>
    %292 = tpu.matmul %289, %291, %cst_93 {dimension_numbers = #tpu.dot_dimension_numbers<[1], [0], [0], [1], [0, 0, 1, 1], [], []>} : vector<16x128xf32>, vector<128x128xf32>, vector<16x128xf32> -> vector<16x128xf32>
    %293 = vector.extract_strided_slice %200 {offsets = [4, 0], sizes = [1, 128], strides = [1, 1]} : vector<8x768xf32> to vector<1x128xf32>
    %294 = vector.broadcast %293 : vector<1x128xf32> to vector<16x128xf32>
    %295 = arith.addf %292, %294 : vector<16x128xf32>
    %cst_94 = arith.constant 5.000000e-01 : f32
    %296 = vector.broadcast %cst_94 : f32 to vector<16x128xf32>
    %297 = arith.mulf %296, %295 : vector<16x128xf32>
    %cst_95 = arith.constant 4.471500e-02 : f32
    %298 = vector.broadcast %cst_95 : f32 to vector<16x128xf32>
    %299 = arith.mulf %298, %295 : vector<16x128xf32>
    %300 = arith.mulf %299, %295 : vector<16x128xf32>
    %301 = arith.mulf %300, %295 : vector<16x128xf32>
    %302 = arith.addf %295, %301 : vector<16x128xf32>
    %cst_96 = arith.constant 0.797884583 : f32
    %303 = vector.broadcast %cst_96 : f32 to vector<16x128xf32>
    %304 = arith.mulf %303, %302 : vector<16x128xf32>
    %305 = math.tanh %304 : vector<16x128xf32>
    %cst_97 = arith.constant 1.000000e+00 : f32
    %306 = vector.broadcast %cst_97 : f32 to vector<16x128xf32>
    %307 = arith.addf %306, %305 : vector<16x128xf32>
    %308 = arith.mulf %297, %307 : vector<16x128xf32>
    %c1_98 = arith.constant 1 : index
    %c0_99 = arith.constant 0 : index
    %c1152_100 = arith.constant 1152 : index
    %309 = vector.load %arg3[%c1_98, %c0_99, %c1152_100] : memref<2x128x1280xf32, #tpu.memory_space<vmem>>, vector<1x128x128xf32>
    %310 = vector.shape_cast %309 : vector<1x128x128xf32> to vector<128x128xf32>
    %cst_101 = arith.constant dense<0.000000e+00> : vector<16x128xf32>
    %311 = tpu.matmul %308, %310, %cst_101 {dimension_numbers = #tpu.dot_dimension_numbers<[1], [0], [0], [1], [0, 0, 1, 1], [], []>} : vector<16x128xf32>, vector<128x128xf32>, vector<16x128xf32> -> vector<16x128xf32>
    %312 = vector.extract_strided_slice %200 {offsets = [5, 0], sizes = [1, 128], strides = [1, 1]} : vector<8x768xf32> to vector<1x128xf32>
    %313 = vector.broadcast %312 : vector<1x128xf32> to vector<16x128xf32>
    %314 = arith.addf %311, %313 : vector<16x128xf32>
    %315 = arith.addf %289, %314 : vector<16x128xf32>
    %316 = vector.extract_strided_slice %200 {offsets = [6, 0], sizes = [1, 128], strides = [1, 1]} : vector<8x768xf32> to vector<1x128xf32>
    %317 = vector.extract_strided_slice %200 {offsets = [7, 0], sizes = [1, 128], strides = [1, 1]} : vector<8x768xf32> to vector<1x128xf32>
    %318 = vector.broadcast %4 : vector<1x128xf32> to vector<16x128xf32>
    %319 = arith.mulf %315, %318 : vector<16x128xf32>
    %cst_102 = arith.constant dense<0.000000e+00> : vector<16xf32>
    %320 = vector.multi_reduction <add>, %319, %cst_102 [1] : vector<16x128xf32> to vector<16xf32>
    %321 = vector.shape_cast %320 : vector<16xf32> to vector<16x1xf32>
    %cst_103 = arith.constant 3.125000e-02 : f32
    %322 = vector.broadcast %cst_103 : f32 to vector<16x1xf32>
    %323 = arith.mulf %321, %322 : vector<16x1xf32>
    %324 = vector.broadcast %323 : vector<16x1xf32> to vector<16x128xf32>
    %325 = arith.subf %315, %324 : vector<16x128xf32>
    %326 = vector.broadcast %4 : vector<1x128xf32> to vector<16x128xf32>
    %327 = arith.mulf %325, %326 : vector<16x128xf32>
    %328 = arith.mulf %327, %327 : vector<16x128xf32>
    %cst_104 = arith.constant dense<0.000000e+00> : vector<16xf32>
    %329 = vector.multi_reduction <add>, %328, %cst_104 [1] : vector<16x128xf32> to vector<16xf32>
    %330 = vector.shape_cast %329 : vector<16xf32> to vector<16x1xf32>
    %cst_105 = arith.constant 3.125000e-02 : f32
    %331 = vector.broadcast %cst_105 : f32 to vector<16x1xf32>
    %332 = arith.mulf %330, %331 : vector<16x1xf32>
    %cst_106 = arith.constant 9.99999996E-13 : f32
    %333 = vector.broadcast %cst_106 : f32 to vector<16x1xf32>
    %334 = arith.addf %332, %333 : vector<16x1xf32>
    %335 = math.rsqrt %334 : vector<16x1xf32>
    %336 = vector.broadcast %335 : vector<16x1xf32> to vector<16x128xf32>
    %337 = arith.mulf %327, %336 : vector<16x128xf32>
    %338 = vector.broadcast %316 : vector<1x128xf32> to vector<16x128xf32>
    %339 = arith.mulf %337, %338 : vector<16x128xf32>
    %340 = vector.broadcast %317 : vector<1x128xf32> to vector<16x128xf32>
    %341 = arith.addf %339, %340 : vector<16x128xf32>
    %342 = vector.extract_strided_slice %341 {offsets = [0, 0], sizes = [1, 128], strides = [1, 1]} : vector<16x128xf32> to vector<1x128xf32>
    %343 = vector.extract_strided_slice %341 {offsets = [8, 0], sizes = [1, 128], strides = [1, 1]} : vector<16x128xf32> to vector<1x128xf32>
    %344 = tpu.concatenate %342, %343 in 0 : vector<1x128xf32>, vector<1x128xf32> -> vector<2x128xf32>
    %c272 = arith.constant 272 : index
    %c0_107 = arith.constant 0 : index
    %345 = vector.load %arg2[%c272, %c0_107] : memref<408x128xf32, #tpu.memory_space<vmem>>, vector<128x128xf32>
    %cst_108 = arith.constant dense<0.000000e+00> : vector<2x128xf32>
    %346 = tpu.matmul %344, %345, %cst_108 {dimension_numbers = #tpu.dot_dimension_numbers<[1], [0], [0], [1], [0, 0, 1, 1], [], []>} : vector<2x128xf32>, vector<128x128xf32>, vector<2x128xf32> -> vector<2x128xf32>
    %347 = vector.extract_strided_slice %23 {offsets = [0, 0], sizes = [1, 128], strides = [1, 1]} : vector<8x128xf32> to vector<1x128xf32>
    %348 = vector.broadcast %347 : vector<1x128xf32> to vector<2x128xf32>
    %349 = arith.addf %346, %348 : vector<2x128xf32>
    %350 = math.tanh %349 : vector<2x128xf32>
    %c0_109 = arith.constant 0 : index
    %c0_110 = arith.constant 0 : index
    %351 = vector.load %arg5[%c0_109, %c0_110] : memref<2x128xf32, #tpu.memory_space<vmem>>, vector<2x128xf32>
    tpu.vector_store %arg5[%c0_109, %c0_110], %350 {strides = array<i32>} : memref<2x128xf32, #tpu.memory_space<vmem>>, vector<2x128xf32>,
    return
  }
}

</mosaic_0001>

<bundles_post_ra>
// kernel: simcse_forward.1
= control target key start
LH: loop header
LB: loop body
LE: loop exit
PB: predicated region body
PF: predicated region fallthrough
CT: control target
= control target key end

     0   :  { %10 = vsyncpa [#allocation3], 0  ;;  %s2323_s0 = inlined_call_operand.vmem [shape: s32[2,16,1], index: 0, kind: input, shape index: {}]   ;;  %s2324_s1 = inlined_call_operand.hbm [shape: f32[2,8], index: 1, kind: input, shape index: {}]   ;;  %s2325_s2 = inlined_call_operand.hbm [shape: f32[408,128], index: 2, kind: input, shape index: {}]   ;;  %s2326_s3 = inlined_call_operand.hbm [shape: f32[2,128,1280], index: 3, kind: input, shape index: {}]   ;;  %s2327_s4 = inlined_call_operand.hbm [shape: f32[2,8,768], index: 4, kind: input, shape index: {}]   ;;  %s2328_s5 = inlined_call_operand.hbm [shape: f32[2,128], index: 5, kind: output, shape index: {}]  }
   0x1   :  { %11 = vsyncpa [#allocation6], 0 }
   0x2   :  { %12 = vsyncpa [#allocation9], 0  ;;  %s31_s20 = sshll.u32 %s2325_s2, 4  ;;  %s32_s20 = int_to_ptr.hbm [resolvable:$true] %s31_s20 }
   0x3   :  { %13 = vsyncpa [#allocation4], 0  ;;  %s2071_s21 = smov [#allocation5]   ;;  %s21_s25 = sshll.u32 %s2324_s1, 4  ;;  %s22_s25 = int_to_ptr.hbm [resolvable:$true] %s21_s25 }
   0x4   :  { %s33_s22 = sshll.u32 %s2071_s21, 4  ;;  %s2072_s26 = smov 128   ;;  %s34_s22 = int_to_ptr.vmem [resolvable:$true] %s33_s22 }
   0x5   :  { %s2073_s27 = smov 8   ;;  %s2074_s28 = smov [#allocation2]  }
   0x6   :  { %39 = dma.hbm_to_vmem [thread:$0]  %s32_s20, 6528, %s34_s22, [#allocation6], %s2072_s26, %s2072_s26, %s2073_s27  }
   0x7   :  { %s23_s29 = sshll.u32 %s2074_s28, 4  ;;  %s44_s7 = sshll.u32 %s2326_s3, 4  ;;  %s24_s29 = int_to_ptr.vmem [resolvable:$true] %s23_s29  ;;  %s45_s7 = int_to_ptr.hbm [resolvable:$true] %s44_s7 }
   0x8   :  { %26 = dma.hbm_to_vmem [thread:$0]  %s22_s25, 32, %s24_s29, [#allocation3]  }
   0x9   :  { %s2075_s2 = smov [#allocation7]   ;;  %s57_s1 = sshll.u32 %s2327_s4, 4  ;;  %s58_s1 = int_to_ptr.hbm [resolvable:$true] %s57_s1 }
   0xa   :  { %s46_s8 = sshll.u32 %s2075_s2, 4  ;;  %s2076_s11 = smov 1280   ;;  %s47_s8 = int_to_ptr.vmem [resolvable:$true] %s46_s8 }
   0xb   :  { %s2077_s12 = smov 80   ;;  %s2078_s13 = smov [#allocation8]  }
   0xc   :  { %52 = dma.hbm_to_vmem [thread:$0]  %s45_s7, 40960, %s47_s8, [#allocation6], %s2076_s11, %s2076_s11, %s2077_s12  }
   0xd   :  { %s59_s14 = sshll.u32 %s2078_s13, 4  ;;  %s2079_s15 = smov 768   ;;  %s60_s14 = int_to_ptr.vmem [resolvable:$true] %s59_s14 }
   0xe   :  { %s2080_s16 = smov 48  }
   0xf   :  { %65 = dma.hbm_to_vmem [thread:$0]  %s58_s1, 1536, %s60_s14, [#allocation9], %s2079_s15, %s2079_s15, %s2080_s16  }
  0x10   :  { %2063 = dma.done.wait [#allocation3], 32  }
  0x11   :  { %2064 = vsyncadd [#allocation3], 4294967264 }
  0x12   :  { %2065 = dma.done.wait [#allocation6], 47488  }
  0x13   :  { %2066 = vsyncadd [#allocation6], 4294919808 }
  0x14   :  { %2067 = dma.done.wait [#allocation9], 1536  }
  0x15   :  { %2068 = vsyncadd [#allocation9], 4294965760  ;;  %v2081_v0 = vmov 0   ;;  %v87_v1 = vld [vmem:[%s2323_s0] sm:$0xff]  ;;  %v88_v2 = vld [vmem:[%s2323_s0 + $0x8] sm:$0xff]  ;;  %v82_v39 = vlaneseq  ;;  %v2082_v46 = vmov 1.0  }
  0x16   :  { %1877 = vset.pattern.permute.xlu0 %v2081_v0  ;;  %1878 = vset.pattern.permute.xlu1 %v2081_v0  ;;  %v1844_v3 = vld [vmem:[%s2323_s0 + $0x10] sm:$0xff]  ;;  %v142_v4 = vld [vmem:[#allocation5 + $0x78] sm:$0xff]  ;;  %v139_v13 = vld [vmem:[#allocation5 + $0x60] sm:$0xff]  ;;  %v2083_v51 = vmov 0.0   ;;  %s1831_s26 = sshll.u32 %s2328_s5, 4  ;;  %s1832_s26 = int_to_ptr.hbm [resolvable:$true] %s1831_s26 }
  0x17   :  { %96 = vperm.xlu0 %1877, %v87_v1   ;;  %99 = vperm.xlu1 %1878, %v88_v2   ;;  %v158_v5 = vld [vmem:[#allocation5 + $0xf8] sm:$0xff]  ;;  %v141_v7 = vld [vmem:[#allocation5 + $0x70] sm:$0xff]  ;;  %v140_v9 = vld [vmem:[#allocation5 + $0x68] sm:$0xff]  ;;  %v92_v11 = vadd.s32 128, %v1844_v3  ;;  %v83_v42 = vand.u32 127, %v82_v39 }
  0x18   :  { %v1845_v6 = vld [vmem:[%s2323_s0 + $0x18] sm:$0xff]  ;;  %161 = vmatpush.msra.mxu0 %v142_v4  ;;  %184 = vmatpush.msra.mxu1 %v158_v5  ;;  %v156_v10 = vld [vmem:[#allocation5 + $0xe8] sm:$0xff]  ;;  %v155_v14 = vld [vmem:[#allocation5 + $0xe0] sm:$0xff]  ;;  %s2084_s0 = smov [#allocation10]  }
  0x19   :  { %v157_v8 = vld [vmem:[#allocation5 + $0xf0] sm:$0xff]  ;;  %v93_v12 = vadd.s32 128, %v1845_v6  ;;  %v138_v15 = vld [vmem:[#allocation5 + $0x58] sm:$0xff]  ;;  %v136_v19 = vld [vmem:[#allocation5 + $0x48] sm:$0xff]  ;;  %v94_v43 = vadd.s32 128, %v83_v42  ;;  %vm84_vm12 = vcmp.lt.s32.totalorder %v83_v42, 32 }
  0x1a   :  { %162 = vmatpush.msra.mxu0 %v141_v7  ;;  %185 = vmatpush.msra.mxu1 %v157_v8  ;;  %v154_v16 = vld [vmem:[#allocation5 + $0xd8] sm:$0xff]  ;;  %v137_v17 = vld [vmem:[#allocation5 + $0x50] sm:$0xff]  ;;  %v152_v20 = vld [vmem:[#allocation5 + $0xc8] sm:$0xff]  ;;  %v2139_v52 = vsel %vm84_vm12, 1.0, %v2083_v51  ;;  %s1829_s23 = sshll.u32 %s2084_s0, 4  ;;  %s1830_s23 = int_to_ptr.vmem [resolvable:$true] %s1829_s23 }
  0x1b   :  { %v153_v18 = vld [vmem:[#allocation5 + $0xd0] sm:$0xff]  ;;  %v135_v21 = vld [vmem:[#allocation5 + $0x40] sm:$0xff]  ;;  %v134_v23 = vld [vmem:[#allocation5 + $0x38] sm:$0xff] }
  0x1c   :  { %163 = vmatpush.msra.mxu0 %v140_v9  ;;  %186 = vmatpush.msra.mxu1 %v156_v10  ;;  %v151_v22 = vld [vmem:[#allocation5 + $0xc0] sm:$0xff]  ;;  %v150_v24 = vld [vmem:[#allocation5 + $0xb8] sm:$0xff]  ;;  %v133_v25 = vld [vmem:[#allocation5 + $0x30] sm:$0xff] }
  0x1d   :  { %v149_v26 = vld [vmem:[#allocation5 + $0xb0] sm:$0xff]  ;;  %v132_v27 = vld [vmem:[#allocation5 + $0x28] sm:$0xff]  ;;  %v131_v29 = vld [vmem:[#allocation5 + $0x20] sm:$0xff] }
  0x1e   :  { %164 = vmatpush.msra.mxu0 %v139_v13  ;;  %187 = vmatpush.msra.mxu1 %v155_v14  ;;  %v148_v28 = vld [vmem:[#allocation5 + $0xa8] sm:$0xff]  ;;  %v147_v30 = vld [vmem:[#allocation5 + $0xa0] sm:$0xff]  ;;  %v130_v31 = vld [vmem:[#allocation5 + $0x18] sm:$0xff] }
  0x1f   :  { %106 = vperm.xlu0 %1877, %v92_v11   ;;  %109 = vperm.xlu1 %1878, %v93_v12   ;;  %v146_v32 = vld [vmem:[#allocation5 + $0x98] sm:$0xff]  ;;  %v129_v33 = vld [vmem:[#allocation5 + $0x10] sm:$0xff]  ;;  %v128_v35 = vld [vmem:[#allocation5 + $0x8] sm:$0xff] }
  0x20   :  { %165 = vmatpush.msra.mxu0 %v138_v15  ;;  %188 = vmatpush.msra.mxu1 %v154_v16  ;;  %v145_v34 = vld [vmem:[#allocation5 + $0x90] sm:$0xff]  ;;  %v144_v36 = vld [vmem:[#allocation5 + $0x88] sm:$0xff]  ;;  %v127_v37 = vld [vmem:[#allocation5] sm:$0xff] }
  0x21   :  { %v143_v38 = vld [vmem:[#allocation5 + $0x80] sm:$0xff]  ;;  %v160_v55 = vld [vmem:[#allocation5 + $0x108] sm:$0xff]  ;;  %v360_v62 = vld [vmem:[#allocation7 + $0x4b8] sm:$0xff] }
  0x22   :  { %166 = vmatpush.msra.mxu0 %v137_v17  ;;  %189 = vmatpush.msra.mxu1 %v153_v18  ;;  %v159_v47 = vld [vmem:[#allocation5 + $0x100] sm:$0xff]  ;;  %v359_v61 = vld [vmem:[#allocation7 + $0x4b0] sm:$0xff]  ;;  %v353_v63 = vld [vmem:[#allocation7 + $0x460] sm:$0xff] }
  0x23   :  { %371 = vmatpush.msra.mxu2 %v359_v61  ;;  %394 = vmatpush.msra.mxu3 %v360_v62  ;;  %v354_v0 = vld [vmem:[#allocation7 + $0x468] sm:$0xff]  ;;  %v347_v1 = vld [vmem:[#allocation7 + $0x410] sm:$0xff]  ;;  %v348_v2 = vld [vmem:[#allocation7 + $0x418] sm:$0xff] }
  0x24   :  { %167 = vmatpush.msra.mxu0 %v136_v19  ;;  %190 = vmatpush.msra.mxu1 %v152_v20  ;;  %v341_v3 = vld [vmem:[#allocation7 + $0x3c0] sm:$0xff]  ;;  %v342_v4 = vld [vmem:[#allocation7 + $0x3c8] sm:$0xff]  ;;  %v335_v7 = vld [vmem:[#allocation7 + $0x370] sm:$0xff] }
  0x25   :  { %372 = vmatpush.msra.mxu2 %v353_v63  ;;  %395 = vmatpush.msra.mxu3 %v354_v0  ;;  %v361_v5 = vld [vmem:[#allocation7 + $0x4c0] sm:$0xff]  ;;  %v362_v6 = vld [vmem:[#allocation7 + $0x4c8] sm:$0xff]  ;;  %v336_v8 = vld [vmem:[#allocation7 + $0x378] sm:$0xff] }
  0x26   :  { %168 = vmatpush.msra.mxu0 %v135_v21  ;;  %191 = vmatpush.msra.mxu1 %v151_v22  ;;  %v355_v9 = vld [vmem:[#allocation7 + $0x470] sm:$0xff]  ;;  %v356_v10 = vld [vmem:[#allocation7 + $0x478] sm:$0xff]  ;;  %v329_v11 = vld [vmem:[#allocation7 + $0x320] sm:$0xff] }
  0x27   :  { %373 = vmatpush.msra.mxu2 %v347_v1  ;;  %396 = vmatpush.msra.mxu3 %v348_v2  ;;  %v330_v12 = vld [vmem:[#allocation7 + $0x328] sm:$0xff]  ;;  %v323_v13 = vld [vmem:[#allocation7 + $0x2d0] sm:$0xff]  ;;  %v324_v14 = vld [vmem:[#allocation7 + $0x2d8] sm:$0xff] }
  0x28   :  { %169 = vmatpush.msra.mxu0 %v134_v23  ;;  %192 = vmatpush.msra.mxu1 %v150_v24  ;;  %v317_v15 = vld [vmem:[#allocation7 + $0x280] sm:$0xff]  ;;  %v318_v16 = vld [vmem:[#allocation7 + $0x288] sm:$0xff]  ;;  %v311_v17 = vld [vmem:[#allocation7 + $0x230] sm:$0xff] }
  0x29   :  { %374 = vmatpush.msra.mxu2 %v341_v3  ;;  %397 = vmatpush.msra.mxu3 %v342_v4  ;;  %v312_v18 = vld [vmem:[#allocation7 + $0x238] sm:$0xff]  ;;  %v337_v39 = vld [vmem:[#allocation7 + $0x380] sm:$0xff]  ;;  %v319_v51 = vld [vmem:[#allocation7 + $0x290] sm:$0xff] }
  0x2a   :  { %170 = vmatpush.msra.mxu0 %v133_v25  ;;  %193 = vmatpush.msra.mxu1 %v149_v26  ;;  %v308_v61 = vld [vmem:[#allocation7 + $0x1f8] sm:$0xff]  ;;  %v357_v62 = vld [vmem:[#allocation7 + $0x480] sm:$0xff]  ;;  %v358_v63 = vld [vmem:[#allocation7 + $0x488] sm:$0xff] }
  0x2b   :  { %375 = vmatpush.msra.mxu2 %v335_v7  ;;  %398 = vmatpush.msra.mxu3 %v336_v8  ;;  %v301_v0 = vld [vmem:[#allocation7 + $0x1a0] sm:$0xff]  ;;  %v302_v1 = vld [vmem:[#allocation7 + $0x1a8] sm:$0xff]  ;;  %v351_v2 = vld [vmem:[#allocation7 + $0x430] sm:$0xff] }
  0x2c   :  { %171 = vmatpush.msra.mxu0 %v132_v27  ;;  %194 = vmatpush.msra.mxu1 %v148_v28  ;;  %v352_v3 = vld [vmem:[#allocation7 + $0x438] sm:$0xff]  ;;  %v295_v4 = vld [vmem:[#allocation7 + $0x150] sm:$0xff]  ;;  %v346_v7 = vld [vmem:[#allocation7 + $0x3e8] sm:$0xff] }
  0x2d   :  { %376 = vmatpush.msra.mxu2 %v329_v11  ;;  %399 = vmatpush.msra.mxu3 %v330_v12  ;;  %v289_v8 = vld [vmem:[#allocation7 + $0x100] sm:$0xff]  ;;  %v340_v11 = vld [vmem:[#allocation7 + $0x398] sm:$0xff]  ;;  %v283_v12 = vld [vmem:[#allocation7 + $0xb0] sm:$0xff] }
  0x2e   :  { %172 = vmatpush.msra.mxu0 %v131_v29  ;;  %195 = vmatpush.msra.mxu1 %v147_v30  ;;  %v305_v29 = vld [vmem:[#allocation7 + $0x1e0] sm:$0xff]  ;;  %v306_v30 = vld [vmem:[#allocation7 + $0x1e8] sm:$0xff] }
  0x2f   :  { %377 = vmatpush.msra.mxu2 %v323_v13  ;;  %400 = vmatpush.msra.mxu3 %v324_v14  ;;  %v284_v13 = vld [vmem:[#allocation7 + $0xb8] sm:$0xff]  ;;  %v333_v14 = vld [vmem:[#allocation7 + $0x340] sm:$0xff] }
  0x30   :  { %173 = vmatpush.msra.mxu0 %v130_v31  ;;  %196 = vmatpush.msra.mxu1 %v146_v32  ;;  %v349_v31 = vld [vmem:[#allocation7 + $0x420] sm:$0xff]  ;;  %v350_v32 = vld [vmem:[#allocation7 + $0x428] sm:$0xff] }
  0x31   :  { %378 = vmatpush.msra.mxu2 %v317_v15  ;;  %401 = vmatpush.msra.mxu3 %v318_v16  ;;  %v334_v15 = vld [vmem:[#allocation7 + $0x348] sm:$0xff]  ;;  %v277_v16 = vld [vmem:[#allocation7 + $0x60] sm:$0xff] }
  0x32   :  { %174 = vmatpush.msra.mxu0 %v129_v33  ;;  %197 = vmatpush.msra.mxu1 %v145_v34  ;;  %v299_v33 = vld [vmem:[#allocation7 + $0x190] sm:$0xff]  ;;  %v300_v34 = vld [vmem:[#allocation7 + $0x198] sm:$0xff] }
  0x33   :  { %379 = vmatpush.msra.mxu2 %v311_v17  ;;  %402 = vmatpush.msra.mxu3 %v312_v18  ;;  %v278_v17 = vld [vmem:[#allocation7 + $0x68] sm:$0xff]  ;;  %v327_v18 = vld [vmem:[#allocation7 + $0x2f0] sm:$0xff] }
  0x34   :  { %175 = vmatpush.msra.mxu0 %v128_v35  ;;  %198 = vmatpush.msra.mxu1 %v144_v36  ;;  %v343_v35 = vld [vmem:[#allocation7 + $0x3d0] sm:$0xff]  ;;  %v344_v36 = vld [vmem:[#allocation7 + $0x3d8] sm:$0xff] }
  0x35   :  { %380 = vmatpush.msra.mxu2 %v305_v29  ;;  %403 = vmatpush.msra.mxu3 %v306_v30  ;;  %v309_v29 = vld [vmem:[#allocation7 + $0x200] sm:$0xff]  ;;  %v310_v30 = vld [vmem:[#allocation7 + $0x208] sm:$0xff] }
  0x36   :  { %176 = vmatpush.msra.mxu0 %v127_v37  ;;  %199 = vmatpush.msra.mxu1 %v143_v38  ;;  %v293_v37 = vld [vmem:[#allocation7 + $0x140] sm:$0xff]  ;;  %v294_v38 = vld [vmem:[#allocation7 + $0x148] sm:$0xff] }
  0x37   :  { %381 = vmatpush.msra.mxu2 %v299_v33  ;;  %404 = vmatpush.msra.mxu3 %v300_v34  ;;  %v304_v33 = vld [vmem:[#allocation7 + $0x1b8] sm:$0xff] }
  0x38   :  { %417 = vmatpush.msrb.mxu0 %v361_v5  ;;  %440 = vmatpush.msrb.mxu1 %v362_v6  ;;  %v296_v5 = vld [vmem:[#allocation7 + $0x158] sm:$0xff]  ;;  %v345_v6 = vld [vmem:[#allocation7 + $0x3e0] sm:$0xff] }
  0x39   :  { %382 = vmatpush.msra.mxu2 %v293_v37  ;;  %405 = vmatpush.msra.mxu3 %v294_v38  ;;  %v291_v37 = vld [vmem:[#allocation7 + $0x110] sm:$0xff]  ;;  %v292_v38 = vld [vmem:[#allocation7 + $0x118] sm:$0xff] }
  0x3a   :  { %418 = vmatpush.msrb.mxu0 %v355_v9  ;;  %441 = vmatpush.msrb.mxu1 %v356_v10  ;;  %v290_v9 = vld [vmem:[#allocation7 + $0x108] sm:$0xff]  ;;  %v339_v10 = vld [vmem:[#allocation7 + $0x390] sm:$0xff] }
  0x3c   :  { %419 = vmatpush.msrb.mxu0 %v349_v31  ;;  %442 = vmatpush.msrb.mxu1 %v350_v32  ;;  %v303_v32 = vld [vmem:[#allocation7 + $0x1b0] sm:$0xff] }
  0x3e   :  { %420 = vmatpush.msrb.mxu0 %v343_v35  ;;  %443 = vmatpush.msrb.mxu1 %v344_v36  ;;  %v297_v35 = vld [vmem:[#allocation7 + $0x160] sm:$0xff]  ;;  %v298_v36 = vld [vmem:[#allocation7 + $0x168] sm:$0xff] }
  0x40   :  { %421 = vmatpush.msrb.mxu0 %v337_v39  ;;  %v285_v39 = vld [vmem:[#allocation7 + $0xc0] sm:$0xff] }
  0x89   :  { %v97_v40 = vpop.permute.xlu0 %96  ;;  %v100_v41 = vpop.permute.xlu1 %99 }
  0x8a   :  { %vm101_vm0 = vcmp.eq.s32.totalorder %v83_v42, %v97_v40  ;;  %vm102_vm3 = vcmp.eq.s32.totalorder %v94_v43, %v97_v40  ;;  %vm103_vm6 = vcmp.eq.s32.totalorder %v83_v42, %v100_v41  ;;  %vm104_vm8 = vcmp.eq.s32.totalorder %v94_v43, %v100_v41  ;;  %v338_v40 = vld [vmem:[#allocation7 + $0x388] sm:$0xff]  ;;  %v287_v41 = vld [vmem:[#allocation7 + $0xf0] sm:$0xff] }
  0x8b   :  { %444 = vmatpush.msrb.mxu1 %v338_v40  ;;  %383 = vmatpush.msra.mxu2 %v287_v41  ;;  %v286_v40 = vld [vmem:[#allocation7 + $0xc8] sm:$0xff] }
  0x91   :  { %v107_v44 = vpop.permute.xlu0 %106  ;;  %v110_v45 = vpop.permute.xlu1 %109 }
  0x92   :  { %vm111_vm1 = vcmp.eq.s32.totalorder %v83_v42, %v107_v44  ;;  %vm112_vm2 = vcmp.eq.s32.totalorder %v94_v43, %v107_v44  ;;  %vm113_vm7 = vcmp.eq.s32.totalorder %v83_v42, %v110_v45  ;;  %vm114_vm9 = vcmp.eq.s32.totalorder %v94_v43, %v110_v45  ;;  %v288_v42 = vld [vmem:[#allocation7 + $0xf8] sm:$0xff]  ;;  %v331_v43 = vld [vmem:[#allocation7 + $0x330] sm:$0xff]  ;;  %v281_v45 = vld [vmem:[#allocation7 + $0xa0] sm:$0xff] }
  0x93   :  { %vm115_vm4 = vmor %vm101_vm0, %vm111_vm1  ;;  %406 = vmatpush.msra.mxu3 %v288_v42  ;;  %v332_v44 = vld [vmem:[#allocation7 + $0x338] sm:$0xff]  ;;  %422 = vmatpush.msrb.mxu0 %v331_v43  ;;  %v279_v43 = vld [vmem:[#allocation7 + $0x70] sm:$0xff] }
  0x94   :  { %1850 = vmatmul.msk.f32.vlgmr.msra.gmra.mxu0 %vm115_vm4, %v2082_v46  ;;  %vm116_vm5 = vmor %vm102_vm3, %vm112_vm2  ;;  %445 = vmatpush.msrb.mxu1 %v332_v44  ;;  %v280_v44 = vld [vmem:[#allocation7 + $0x78] sm:$0xff]  ;;  %vm557_vm3 = vcmask 64512  }
  0x95   :  { %1852 = vmatmul.msk.f32.vlgmr.msra.gmra.mxu1 %vm116_vm5, %v2082_v46  ;;  %vm117_vm10 = vmor %vm103_vm6, %vm113_vm7  ;;  %384 = vmatpush.msra.mxu2 %v281_v45 }
  0x96   :  { %vm118_vm11 = vmor %vm104_vm8, %vm114_vm9 }
  0x9c   :  { %1851 = vmatmul.msk.f32.gmra.mxu0 %vm117_vm10, %v2082_v46 }
  0x9d   :  { %1853 = vmatmul.msk.f32.gmra.mxu1 %vm118_vm11, %v2082_v46  ;;  %v282_v46 = vld [vmem:[#allocation7 + $0xa8] sm:$0xff] }
  0x9e   :  { %407 = vmatpush.msra.mxu3 %v282_v46 }
 0x111   :  { %v178_v48 = vpop.f32.mrf.mxu0 }
 0x112   :  { %v179_v49 = vadd.f32 %v178_v48, %v159_v47  ;;  %v201_v50 = vpop.f32.mrf.mxu1  ;;  %v325_v47 = vld [vmem:[#allocation7 + $0x2e0] sm:$0xff]  ;;  %v326_v48 = vld [vmem:[#allocation7 + $0x2e8] sm:$0xff] }
 0x113   :  { %423 = vmatpush.msrb.mxu0 %v325_v47  ;;  %446 = vmatpush.msrb.mxu1 %v326_v48  ;;  %v273_v47 = vld [vmem:[#allocation7 + $0x20] sm:$0xff]  ;;  %v274_v48 = vld [vmem:[#allocation7 + $0x28] sm:$0xff] }
 0x114   :  { %v202_v53 = vadd.f32 %v201_v50, %v179_v49  ;;  %v275_v49 = vld [vmem:[#allocation7 + $0x50] sm:$0xff]  ;;  %v276_v50 = vld [vmem:[#allocation7 + $0x58] sm:$0xff] }
 0x115   :  { %385 = vmatpush.msra.mxu2 %v275_v49  ;;  %408 = vmatpush.msra.mxu3 %v276_v50 }
 0x116   :  { %v208_v54 = vmul.f32 %v2139_v52, %v202_v53  ;;  %424 = vmatpush.msrb.mxu0 %v319_v51 }
 0x118   :  { %210 = vadd.xlane.f32.xlu2 %v208_v54  ;;  %v269_v54 = vld [vmem:[#allocation7] sm:$0xff] }
 0x119   :  { %v181_v56 = vpop.f32.mrf.mxu0  ;;  %386 = vmatpush.msra.mxu2 %v269_v54 }
 0x11a   :  { %v182_v57 = vadd.f32 %v181_v56, %v160_v55  ;;  %v204_v58 = vpop.f32.mrf.mxu1  ;;  %v270_v55 = vld [vmem:[#allocation7 + $0x8] sm:$0xff]  ;;  %v313_v56 = vld [vmem:[#allocation7 + $0x240] sm:$0xff] }
 0x11b   :  { %409 = vmatpush.msra.mxu3 %v270_v55  ;;  %425 = vmatpush.msrb.mxu0 %v313_v56 }
 0x11c   :  { %v205_v59 = vadd.f32 %v204_v58, %v182_v57  ;;  %v314_v57 = vld [vmem:[#allocation7 + $0x248] sm:$0xff]  ;;  %v363_v58 = vld [vmem:[#allocation7 + $0x4d0] sm:$0xff] }
 0x11d   :  { %463 = vmatpush.msrb.mxu2 %v363_v58 }
 0x11e   :  { %v209_v60 = vmul.f32 %v2139_v52, %v205_v59 }
 0x11f   :  { %464 = vmatpush.msrb.mxu2 %v357_v62 }
 0x120   :  { %212 = vadd.xlane.f32.xlu0 %v209_v60  ;;  %v307_v60 = vld [vmem:[#allocation7 + $0x1f0] sm:$0xff] }
 0x121   :  { %426 = vmatpush.msrb.mxu0 %v307_v60  ;;  %465 = vmatpush.msrb.mxu2 %v351_v2 }
 0x123   :  { %427 = vmatpush.msrb.mxu0 %v301_v0  ;;  %466 = vmatpush.msrb.mxu2 %v345_v6 }
 0x125   :  { %428 = vmatpush.msrb.mxu0 %v295_v4  ;;  %467 = vmatpush.msrb.mxu2 %v339_v10 }
 0x127   :  { %429 = vmatpush.msrb.mxu0 %v289_v8  ;;  %468 = vmatpush.msrb.mxu2 %v333_v14 }
 0x129   :  { %430 = vmatpush.msrb.mxu0 %v283_v12  ;;  %469 = vmatpush.msrb.mxu2 %v327_v18 }
 0x12b   :  { %431 = vmatpush.msrb.mxu0 %v277_v16 }
 0x18b   :  { %v211_v19 = vpop.xlane.xlu2 %210 }
 0x18c   :  { %v214_v20 = vmul.f32 0.03125, %v211_v19  ;;  %v328_v19 = vld [vmem:[#allocation7 + $0x2f8] sm:$0xff] }
 0x18e   :  { %v216_v21 = vsub.f32 %v202_v53, %v214_v20  ;;  %v320_v53 = vld [vmem:[#allocation7 + $0x298] sm:$0xff]  ;;  %v271_v20 = vld [vmem:[#allocation7 + $0x10] sm:$0xff] }
 0x18f   :  { %447 = vmatpush.msrb.mxu1 %v320_v53  ;;  %432 = vmatpush.msrb.mxu0 %v271_v20  ;;  %v207_v53 = vld [vmem:[#allocation5 + $0x190] sm:$0xff] }
 0x190   :  { %v2144_v22 = vmul.f32 %v2139_v52, %v216_v21  ;;  %v272_v21 = vld [vmem:[#allocation7 + $0x18] sm:$0xff]  ;;  %v252_v58 = vperm.slane %v207_v53, 1 }
 0x191   :  { %448 = vmatpush.msrb.mxu1 %v314_v57 }
 0x192   :  { %v220_v23 = vmul.f32 %v2144_v22, %v2144_v22 }
 0x193   :  { %v213_v24 = vpop.xlane.xlu0 %212  ;;  %449 = vmatpush.msrb.mxu1 %v308_v61  ;;  %v255_v61 = vperm.slane %v207_v53, 2 }
 0x194   :  { %v215_v25 = vmul.f32 0.03125, %v213_v24  ;;  %222 = vadd.xlane.f32.xlu2 %v220_v23  ;;  %v321_v23 = vld [vmem:[#allocation7 + $0x2a0] sm:$0xff]  ;;  %v322_v24 = vld [vmem:[#allocation7 + $0x2a8] sm:$0xff] }
 0x195   :  { %450 = vmatpush.msrb.mxu1 %v302_v1  ;;  %470 = vmatpush.msrb.mxu2 %v321_v23 }
 0x196   :  { %v217_v26 = vsub.f32 %v205_v59, %v215_v25  ;;  %v364_v59 = vld [vmem:[#allocation7 + $0x4d8] sm:$0xff]  ;;  %v315_v25 = vld [vmem:[#allocation7 + $0x250] sm:$0xff] }
 0x197   :  { %486 = vmatpush.msrb.mxu3 %v364_v59  ;;  %451 = vmatpush.msrb.mxu1 %v296_v5 }
 0x198   :  { %v2149_v27 = vmul.f32 %v2139_v52, %v217_v26  ;;  %v316_v26 = vld [vmem:[#allocation7 + $0x258] sm:$0xff]  ;;  %471 = vmatpush.msrb.mxu2 %v315_v25  ;;  %v268_v25 = vld [vmem:[#allocation8 + $0x28] sm:$0xff] }
 0x199   :  { %487 = vmatpush.msrb.mxu3 %v358_v63  ;;  %452 = vmatpush.msrb.mxu1 %v290_v9  ;;  %v2171_v9 = vld [vmem:[#allocation8] sm:$0xff] }
 0x19a   :  { %v221_v28 = vmul.f32 %v2149_v27, %v2149_v27  ;;  %472 = vmatpush.msrb.mxu2 %v309_v29  ;;  %v365_v12 = vperm.slane %v2171_v9, 0 }
 0x19b   :  { %488 = vmatpush.msrb.mxu3 %v352_v3  ;;  %453 = vmatpush.msrb.mxu1 %v284_v13 }
 0x19c   :  { %224 = vadd.xlane.f32.xlu1 %v221_v28  ;;  %473 = vmatpush.msrb.mxu2 %v303_v32 }
 0x19d   :  { %489 = vmatpush.msrb.mxu3 %v346_v7  ;;  %454 = vmatpush.msrb.mxu1 %v278_v17  ;;  %v265_v7 = vld [vmem:[#allocation8 + $0x10] sm:$0xff] }
 0x19e   :  { %474 = vmatpush.msrb.mxu2 %v297_v35 }
 0x19f   :  { %490 = vmatpush.msrb.mxu3 %v340_v11  ;;  %455 = vmatpush.msrb.mxu1 %v272_v21  ;;  %v367_v11 = vperm.slane %v265_v7, 0  ;;  %v638_v7 = vld [vmem:[#allocation7 + $0x3f0] sm:$0xff] }
 0x1a0   :  { %475 = vmatpush.msrb.mxu2 %v291_v37 }
 0x1a1   :  { %491 = vmatpush.msrb.mxu3 %v334_v15 }
 0x1a2   :  { %476 = vmatpush.msrb.mxu2 %v285_v39 }
 0x1a3   :  { %492 = vmatpush.msrb.mxu3 %v328_v19 }
 0x1a4   :  { %477 = vmatpush.msrb.mxu2 %v279_v43 }
 0x1a5   :  { %493 = vmatpush.msrb.mxu3 %v322_v24  ;;  %v267_v24 = vld [vmem:[#allocation8 + $0x20] sm:$0xff] }
 0x1a6   :  { %478 = vmatpush.msrb.mxu2 %v273_v47  ;;  %v369_v29 = vperm.slane %v267_v24, 0 }
 0x1a7   :  { %494 = vmatpush.msrb.mxu3 %v316_v26 }
 0x1a9   :  { %495 = vmatpush.msrb.mxu3 %v310_v30  ;;  %v370_v30 = vperm.slane %v268_v25, 0  ;;  %v629_v25 = vld [vmem:[#allocation7 + $0x120] sm:$0xff] }
 0x1ab   :  { %496 = vmatpush.msrb.mxu3 %v304_v33 }
 0x1ad   :  { %497 = vmatpush.msrb.mxu3 %v298_v36 }
 0x1af   :  { %498 = vmatpush.msrb.mxu3 %v292_v38 }
 0x1b1   :  { %499 = vmatpush.msrb.mxu3 %v286_v40 }
 0x1b3   :  { %500 = vmatpush.msrb.mxu3 %v280_v44 }
 0x1b5   :  { %501 = vmatpush.msrb.mxu3 %v274_v48 }
 0x207   :  { %v223_v28 = vpop.xlane.xlu2 %222 }
 0x208   :  { %v226_v31 = vmul.f32 0.03125, %v223_v28  ;;  %v2174_v28 = vld [vmem:[#allocation8 + $0x18] sm:$0xff] }
 0x20a   :  { %v228_v34 = vadd.f32 1e-12, %v226_v31  ;;  %v368_v31 = vperm.slane %v2174_v28, 0  ;;  %v626_v28 = vld [vmem:[#allocation7 + $0x30] sm:$0xff] }
 0x20c   :  { %1879 = vrsqrt.f32 %v228_v34  ;;  %vm236_vm14 = vweird.f32 %v228_v34 }
 0x20f   :  { %v225_v41 = vpop.xlane.xlu1 %224 }
 0x210   :  { %v227_v42 = vmul.f32 0.03125, %v225_v41 }
 0x212   :  { %v1880_v45 = vpop.eup %1879  ;;  %v229_v46 = vadd.f32 1e-12, %v227_v42  ;;  %v258_v42 = vld [vmem:[#allocation2] sm:$0x3] }
 0x213   :  { %v231_v49 = vmul.f32 %v1880_v45, %v228_v34  ;;  %vm237_vm13 = vweird.f32 %v1880_v45  ;;  %v1854_v43 = vadd.f32 -1.0, %v258_v42 }
 0x214   :  { %1881 = vrsqrt.f32 %v229_v46  ;;  %vm238_vm15 = vmor %vm236_vm14, %vm237_vm13  ;;  %vm246_vm1 = vweird.f32 %v229_v46 }
 0x215   :  { %v232_v50 = vmul.f32 %v1880_v45, %v231_v49  ;;  %v260_v44 = vmul.f32 1e+09, %v1854_v43 }
 0x217   :  { %v233_v51 = vmul.f32 0.5, %v232_v50 }
 0x219   :  { %v234_v54 = vsub.f32 1.5, %v233_v51 }
 0x21a   :  { %v1882_v55 = vpop.eup %1881 }
 0x21b   :  { %v235_v56 = vmul.f32 %v1880_v45, %v234_v54  ;;  %v241_v57 = vmul.f32 %v1882_v55, %v229_v46  ;;  %vm247_vm0 = vweird.f32 %v1882_v55 }
 0x21c   :  { %vm248_vm2 = vmor %vm246_vm1, %vm247_vm0 }
 0x21d   :  { %v239_v59 = vsel %vm238_vm15, %v1880_v45, %v235_v56  ;;  %v242_v60 = vmul.f32 %v1882_v55, %v241_v57  ;;  %v2179_v45 = vperm.slane %v260_v44, 0  ;;  %v262_v56 = vrot.slane %v260_v44, 1 }
 0x21e   :  { %v250_v62 = vmul.f32 %v239_v59, %v2144_v22 }
 0x21f   :  { %v243_v63 = vmul.f32 0.5, %v242_v60  ;;  %v2184_v60 = vperm.slane %v262_v56, 0  ;;  %v793_v56 = vld [vmem:[#allocation7 + $0x448] sm:$0xff] }
 0x220   :  { %v253_v0 = vmul.f32 %v252_v58, %v250_v62 }
 0x221   :  { %v244_v1 = vsub.f32 1.5, %v243_v63 }
 0x222   :  { %v2154_v2 = vadd.f32 %v255_v61, %v253_v0 }
 0x223   :  { %v245_v3 = vmul.f32 %v1882_v55, %v244_v1 }
 0x224   :  { %387 = vmatmul.f32.vlgmr.msra.gmra.mxu2 %v2154_v2  ;;  %410 = vmatmul.f32.vlgmr.msra.gmra.mxu3 %v2154_v2 }
 0x225   :  { %v249_v4 = vsel %vm248_vm2, %v1882_v55, %v245_v3  ;;  %433 = vmatmul.f32.vlgmr.msrb.gmra.mxu0 %v2154_v2  ;;  %456 = vmatmul.f32.vlgmr.msrb.gmra.mxu1 %v2154_v2 }
 0x226   :  { %v251_v22 = vmul.f32 %v249_v4, %v2149_v27  ;;  %v264_v27 = vld [vmem:[#allocation8 + $0x8] sm:$0xff]  ;;  %v641_v4 = vld [vmem:[#allocation7 + $0x4e0] sm:$0xff] }
 0x227   :  { %v366_v10 = vperm.slane %v264_v27, 0  ;;  %642 = vmatpush.msra.mxu0 %v641_v4  ;;  %v783_v4 = vld [vmem:[#allocation7 + $0x128] sm:$0xff] }
 0x228   :  { %v254_v5 = vmul.f32 %v252_v58, %v251_v22  ;;  %v640_v22 = vld [vmem:[#allocation7 + $0x490] sm:$0xff] }
 0x229   :  { %643 = vmatpush.msra.mxu0 %v640_v22  ;;  %v782_v22 = vld [vmem:[#allocation7 + $0xd8] sm:$0xff] }
 0x22a   :  { %v2161_v6 = vadd.f32 %v255_v61, %v254_v5  ;;  %v639_v5 = vld [vmem:[#allocation7 + $0x440] sm:$0xff] }
 0x22b   :  { %644 = vmatpush.msra.mxu0 %v639_v5  ;;  %v781_v5 = vld [vmem:[#allocation7 + $0x88] sm:$0xff] }
 0x22c   :  { %390 = vmatmul.f32.gmra.mxu2 %v2161_v6  ;;  %413 = vmatmul.f32.gmra.mxu3 %v2161_v6 }
 0x22d   :  { %436 = vmatmul.f32.gmra.mxu0 %v2161_v6  ;;  %459 = vmatmul.f32.gmra.mxu1 %v2161_v6 }
 0x22e   :  { %645 = vmatpush.msra.mxu0 %v638_v7 }
 0x234   :  { %479 = vmatmul.f32.vlgmr.msrb.gmra.mxu2 %v2154_v2  ;;  %502 = vmatmul.f32.vlgmr.msrb.gmra.mxu3 %v2154_v2 }
 0x23c   :  { %482 = vmatmul.f32.gmra.mxu2 %v2161_v6  ;;  %505 = vmatmul.f32.gmra.mxu3 %v2161_v6 }
 0x2a2   :  { %v434_v8 = vpop.f32.mrf.mxu0  ;;  %v457_v34 = vpop.f32.mrf.mxu1 }
 0x2a3   :  { %v435_v16 = vadd.f32 %v434_v8, %v367_v11  ;;  %v458_v37 = vadd.f32 %v457_v34, %v368_v31  ;;  %v637_v8 = vld [vmem:[#allocation7 + $0x3a0] sm:$0xff] }
 0x2a4   :  { %646 = vmatpush.msra.mxu0 %v637_v8 }
 0x2a7   :  { %v388_v13 = vpop.f32.mrf.mxu2  ;;  %v411_v14 = vpop.f32.mrf.mxu3 }
 0x2a8   :  { %v412_v15 = vadd.f32 %v411_v14, %v366_v10  ;;  %v389_v18 = vadd.f32 %v388_v13, %v365_v12 }
 0x2aa   :  { %v437_v17 = vpop.f32.mrf.mxu0  ;;  %524 = vmatpush.xpose.msra.mxu2 %v412_v15  ;;  %v460_v50 = vpop.f32.mrf.mxu1  ;;  %v634_v15 = vld [vmem:[#allocation7 + $0x2b0] sm:$0xff] }
 0x2ab   :  { %v438_v19 = vadd.f32 %v437_v17, %v367_v11  ;;  %v632_v17 = vld [vmem:[#allocation7 + $0x210] sm:$0xff] }
 0x2ad   :  { %621 = vmatpush.msra.mxu3 %v438_v19  ;;  %525 = vmatmul.f32.vlgmr.msra.gmra.mxu2 %v389_v18  ;;  %v631_v18 = vld [vmem:[#allocation7 + $0x1c0] sm:$0xff]  ;;  %v461_v19 = vadd.f32 %v460_v50, %v368_v31 }
 0x2ae   :  { %598 = vmatpush.msrb.mxu2 %v435_v16  ;;  %v633_v16 = vld [vmem:[#allocation7 + $0x260] sm:$0xff] }
 0x2af   :  { %v391_v20 = vpop.f32.mrf.mxu2  ;;  %v414_v21 = vpop.f32.mrf.mxu3 }
 0x2b0   :  { %v415_v23 = vadd.f32 %v414_v21, %v366_v10  ;;  %v392_v26 = vadd.f32 %v391_v20, %v365_v12  ;;  %v636_v10 = vld [vmem:[#allocation7 + $0x350] sm:$0xff]  ;;  %v635_v12 = vld [vmem:[#allocation7 + $0x300] sm:$0xff] }
 0x2b1   :  { %647 = vmatpush.msra.mxu0 %v636_v10 }
 0x2b2   :  { %544 = vmatpush.xpose.msra.mxu1 %v415_v23  ;;  %v630_v23 = vld [vmem:[#allocation7 + $0x170] sm:$0xff] }
 0x2b3   :  { %648 = vmatpush.msra.mxu0 %v635_v12 }
 0x2b5   :  { %545 = vmatmul.f32.vlgmr.msra.gmra.mxu1 %v392_v26  ;;  %649 = vmatpush.msra.mxu0 %v634_v15  ;;  %v628_v26 = vld [vmem:[#allocation7 + $0xd0] sm:$0xff] }
 0x2b7   :  { %v480_v32 = vpop.f32.mrf.mxu2  ;;  %v503_v33 = vpop.f32.mrf.mxu3  ;;  %650 = vmatpush.msra.mxu0 %v633_v16 }
 0x2b8   :  { %v481_v35 = vadd.f32 %v480_v32, %v369_v29  ;;  %v504_v36 = vadd.f32 %v503_v33, %v370_v30 }
 0x2b9   :  { %651 = vmatpush.msra.mxu0 %v632_v17 }
 0x2ba   :  { %683 = vmatpush.xpose.msrb.mxu1 %v481_v35  ;;  %752 = vmatpush.msrb.mxu3 %v504_v36 }
 0x2bb   :  { %652 = vmatpush.msra.mxu0 %v631_v18 }
 0x2bd   :  { %684 = vmatmul.f32.vlgmr.msrb.gmra.mxu1 %v458_v37  ;;  %653 = vmatpush.msra.mxu0 %v630_v23 }
 0x2bf   :  { %v483_v38 = vpop.f32.mrf.mxu2  ;;  %v506_v39 = vpop.f32.mrf.mxu3  ;;  %654 = vmatpush.msra.mxu0 %v629_v25 }
 0x2c0   :  { %v484_v40 = vadd.f32 %v483_v38, %v369_v29  ;;  %v507_v41 = vadd.f32 %v506_v39, %v370_v30  ;;  %v627_v29 = vld [vmem:[#allocation7 + $0x80] sm:$0xff] }
 0x2c1   :  { %655 = vmatpush.msra.mxu0 %v628_v26 }
 0x2c2   :  { %703 = vmatpush.xpose.msra.mxu2 %v484_v40  ;;  %775 = vmatpush.msra.mxu1 %v507_v41  ;;  %v795_v41 = vld [vmem:[#allocation7 + $0x4e8] sm:$0xff] }
 0x2c3   :  { %656 = vmatpush.msra.mxu0 %v627_v29 }
 0x2c5   :  { %657 = vmatpush.msra.mxu0 %v626_v28 }
 0x330   :  { %v526_v46 = vpop.f32.mrf.mxu2 }
 0x331   :  { %v549_v47 = vmul.f32 0.25, %v526_v46 }
 0x332   :  { %v546_v55 = vpop.f32.mrf.mxu1 }
 0x333   :  { %v555_v48 = vadd.f32 %v2179_v45, %v549_v47  ;;  %v550_v58 = vmul.f32 0.25, %v546_v55  ;;  %v794_v55 = vld [vmem:[#allocation7 + $0x498] sm:$0xff] }
 0x335   :  { %v558_v49 = vsel %vm557_vm3, %v555_v48, -inf  ;;  %v556_v61 = vadd.f32 %v2184_v60, %v550_v58  ;;  %v791_v58 = vld [vmem:[#allocation7 + $0x3a8] sm:$0xff] }
 0x336   :  { %559 = vmax.xlane.f32.xlu2 %v558_v49 }
 0x337   :  { %v561_v0 = vsel %vm557_vm3, %v556_v61, -inf }
 0x33a   :  { %v685_v62 = vpop.f32.mrf.mxu1 }
 0x33b   :  { %v708_v63 = vmul.f32 0.25, %v685_v62  ;;  %v788_v62 = vld [vmem:[#allocation7 + $0x2b8] sm:$0xff] }
 0x33d   :  { %v710_v1 = vadd.f32 %v708_v63, %v2179_v45  ;;  %v787_v63 = vld [vmem:[#allocation7 + $0x268] sm:$0xff] }
 0x33f   :  { %v712_v3 = vsel %vm557_vm3, %v710_v1, -inf }
 0x3a9   :  { %v560_v51 = vpop.xlane.xlu2 %559 }
 0x3aa   :  { %v564_v53 = vsub.f32 %v555_v48, %v560_v51 }
 0x3ac   :  { %v566_v54 = vmul.f32 1.442695, %v564_v53 }
 0x3ae   :  { %1883 = vpow2.f32 %v566_v54 }
 0x3b4   :  { %v1884_v57 = vpop.eup %1883 }
 0x3b5   :  { %v570_v59 = vsel %vm557_vm3, %v1884_v57, 0.0 }
 0x3b6   :  { %571 = vadd.xlane.f32.xlu2 %v570_v59  ;;  %v790_v59 = vld [vmem:[#allocation7 + $0x358] sm:$0xff] }
 0x3be   :  { %562 = vmax.xlane.f32.xlu2 %v561_v0  ;;  %v786_v0 = vld [vmem:[#allocation7 + $0x218] sm:$0xff] }
 0x3c6   :  { %713 = vmax.xlane.f32.xlu2 %v712_v3  ;;  %v784_v3 = vld [vmem:[#allocation7 + $0x178] sm:$0xff] }
 0x429   :  { %v572_v27 = vpop.xlane.xlu2 %571 }
 0x42a   :  { %1885 = vrcp.f32 %v572_v27  ;;  %v780_v27 = vld [vmem:[#allocation7 + $0x38] sm:$0xff] }
 0x430   :  { %v1886_v11 = vpop.eup %1885 }
 0x431   :  { %v578_v13 = vmul.f32 %v1886_v11, %v1884_v57  ;;  %v563_v14 = vpop.xlane.xlu2 %562  ;;  %v792_v57 = vld [vmem:[#allocation7 + $0x3f8] sm:$0xff] }
 0x432   :  { %v565_v33 = vsub.f32 %v556_v61, %v563_v14  ;;  %v789_v61 = vld [vmem:[#allocation7 + $0x308] sm:$0xff]  ;;  %v665_v14 = vperm.slane %v2171_v9, 1 }
 0x433   :  { %1855 = vmatmul.msk.f32.vlgmr.msrb.gmra.mxu2 %vm557_vm3, %v578_v13 }
 0x434   :  { %v568_v34 = vmul.f32 1.442695, %v565_v33  ;;  %796 = vmatpush.msrb.mxu2 %v795_v41  ;;  %v880_v41 = vld [vmem:[#allocation7 + $0x270] sm:$0xff] }
 0x436   :  { %797 = vmatpush.msrb.mxu2 %v794_v55 }
 0x438   :  { %798 = vmatpush.msrb.mxu2 %v793_v56 }
 0x439   :  { %v714_v20 = vpop.xlane.xlu2 %713 }
 0x43a   :  { %v718_v21 = vsub.f32 %v710_v1, %v714_v20  ;;  %799 = vmatpush.msrb.mxu2 %v792_v57  ;;  %v785_v1 = vld [vmem:[#allocation7 + $0x1c8] sm:$0xff] }
 0x43b   :  { %704 = vmatmul.f32.vlgmr.msra.gmra.mxu2 %v461_v19 }
 0x43c   :  { %v720_v24 = vmul.f32 1.442695, %v718_v21  ;;  %800 = vmatpush.msrb.mxu2 %v791_v58 }
 0x43e   :  { %1887 = vpow2.f32 %v720_v24  ;;  %801 = vmatpush.msrb.mxu2 %v790_v59 }
 0x43f   :  { %1889 = vpow2.f32 %v568_v34  ;;  %v887_v34 = vld [vmem:[#allocation7 + $0x4a0] sm:$0xff] }
 0x440   :  { %802 = vmatpush.msrb.mxu2 %v789_v61 }
 0x442   :  { %803 = vmatpush.msrb.mxu2 %v788_v62 }
 0x444   :  { %v1888_v30 = vpop.eup %1887  ;;  %804 = vmatpush.msrb.mxu2 %v787_v63 }
 0x445   :  { %v724_v32 = vsel %vm557_vm3, %v1888_v30, 0.0  ;;  %v1890_v39 = vpop.eup %1889 }
 0x446   :  { %725 = vadd.xlane.f32.xlu0 %v724_v32  ;;  %v573_v40 = vsel %vm557_vm3, %v1890_v39, 0.0  ;;  %805 = vmatpush.msrb.mxu2 %v786_v0 }
 0x448   :  { %806 = vmatpush.msrb.mxu2 %v785_v1  ;;  %v867_v1 = vperm.slane %v2171_v9, 2 }
 0x44a   :  { %807 = vmatpush.msrb.mxu2 %v784_v3 }
 0x44c   :  { %808 = vmatpush.msrb.mxu2 %v783_v4 }
 0x44e   :  { %809 = vmatpush.msrb.mxu2 %v782_v22  ;;  %v870_v22 = vperm.slane %v2171_v9, 3 }
 0x450   :  { %810 = vmatpush.msrb.mxu2 %v781_v5 }
 0x452   :  { %811 = vmatpush.msrb.mxu2 %v780_v27 }
 0x4b6   :  { %v600_v31 = vpop.f32.mrf.mxu2 }
 0x4b7   :  { %658 = vmatmul.f32.vlgmr.msra.gmra.mxu0 %v600_v31 }
 0x4b9   :  { %v726_v48 = vpop.xlane.xlu0 %725 }
 0x4be   :  { %v705_v35 = vpop.f32.mrf.mxu2 }
 0x4bf   :  { %v709_v36 = vmul.f32 0.25, %v705_v35  ;;  %v886_v35 = vld [vmem:[#allocation7 + $0x450] sm:$0xff] }
 0x4c1   :  { %v711_v37 = vadd.f32 %v709_v36, %v2184_v60  ;;  %v885_v36 = vld [vmem:[#allocation7 + $0x400] sm:$0xff] }
 0x4c3   :  { %v715_v38 = vsel %vm557_vm3, %v711_v37, -inf }
 0x4c4   :  { %716 = vmax.xlane.f32.xlu2 %v715_v38  ;;  %v882_v38 = vld [vmem:[#allocation7 + $0x310] sm:$0xff] }
 0x4cc   :  { %574 = vadd.xlane.f32.xlu2 %v573_v40 }
 0x534   :  { %v659_v15 = vpop.f32.mrf.mxu0 }
 0x535   :  { %v666_v16 = vadd.f32 %v665_v14, %v659_v15 }
 0x537   :  { %v717_v42 = vpop.xlane.xlu2 %716 }
 0x538   :  { %v719_v43 = vsub.f32 %v711_v37, %v717_v42  ;;  %v884_v37 = vld [vmem:[#allocation7 + $0x3b0] sm:$0xff] }
 0x53a   :  { %v722_v44 = vmul.f32 1.442695, %v719_v43  ;;  %v879_v43 = vld [vmem:[#allocation7 + $0x220] sm:$0xff] }
 0x53c   :  { %1891 = vpow2.f32 %v722_v44 }
 0x53f   :  { %v575_v46 = vpop.xlane.xlu2 %574 }
 0x540   :  { %1893 = vrcp.f32 %v575_v46  ;;  %v878_v46 = vld [vmem:[#allocation7 + $0x1d0] sm:$0xff] }
 0x541   :  { %1895 = vrcp.f32 %v726_v48  ;;  %v877_v48 = vld [vmem:[#allocation7 + $0x180] sm:$0xff] }
 0x542   :  { %v1892_v47 = vpop.eup %1891 }
 0x543   :  { %v727_v49 = vsel %vm557_vm3, %v1892_v47, 0.0 }
 0x544   :  { %728 = vadd.xlane.f32.xlu1 %v727_v49 }
 0x546   :  { %v1894_v50 = vpop.eup %1893 }
 0x547   :  { %v579_v51 = vmul.f32 %v1894_v50, %v1890_v39  ;;  %v1896_v53 = vpop.eup %1895  ;;  %v881_v39 = vld [vmem:[#allocation7 + $0x2c0] sm:$0xff]  ;;  %v876_v50 = vld [vmem:[#allocation7 + $0x130] sm:$0xff] }
 0x548   :  { %v732_v54 = vmul.f32 %v1896_v53, %v1888_v30  ;;  %v874_v53 = vld [vmem:[#allocation7 + $0x90] sm:$0xff] }
 0x549   :  { %1856 = vmatmul.msk.f32.vlgmr.msra.gmra.mxu3 %vm557_vm3, %v579_v51  ;;  %v875_v51 = vld [vmem:[#allocation7 + $0xe0] sm:$0xff] }
 0x551   :  { %1857 = vmatmul.msk.f32.vlgmr.msrb.gmra.mxu3 %vm557_vm3, %v732_v54  ;;  %v873_v54 = vld [vmem:[#allocation7 + $0x40] sm:$0xff] }
 0x5b7   :  { %v729_v7 = vpop.xlane.xlu1 %728 }
 0x5b8   :  { %1897 = vrcp.f32 %v729_v7  ;;  %v946_v7 = vld [vmem:[#allocation7 + $0x4f8] sm:$0xff] }
 0x5b9   :  { %948 = vmatpush.msrb.mxu1 %v946_v7 }
 0x5be   :  { %v1898_v8 = vpop.eup %1897 }
 0x5bf   :  { %v733_v10 = vmul.f32 %v1898_v8, %v1892_v47  ;;  %v945_v8 = vld [vmem:[#allocation7 + $0x4a8] sm:$0xff] }
 0x5c0   :  { %949 = vmatpush.msrb.mxu1 %v945_v8 }
 0x5c1   :  { %1858 = vmatmul.msk.f32.vlgmr.msra.gmra.mxu1 %vm557_vm3, %v733_v10  ;;  %v944_v10 = vld [vmem:[#allocation7 + $0x458] sm:$0xff] }
 0x5c2   :  { %950 = vmatpush.msrb.mxu1 %v944_v10 }
 0x5cc   :  { %v623_v11 = vpop.f32.mrf.mxu3 }
 0x5cd   :  { %661 = vmatmul.f32.gmra.mxu0 %v623_v11 }
 0x5d4   :  { %v754_v12 = vpop.f32.mrf.mxu3 }
 0x5d5   :  { %812 = vmatmul.f32.vlgmr.msrb.gmra.mxu2 %v754_v12 }
 0x63e   :  { %v777_v13 = vpop.f32.mrf.mxu1 }
 0x63f   :  { %815 = vmatmul.f32.gmra.mxu2 %v777_v13  ;;  %v943_v13 = vld [vmem:[#allocation7 + $0x408] sm:$0xff] }
 0x640   :  { %951 = vmatpush.msrb.mxu1 %v943_v13 }
 0x64a   :  { %v662_v21 = vpop.f32.mrf.mxu0 }
 0x64b   :  { %v667_v23 = vadd.f32 %v665_v14, %v662_v21 }
 0x658   :  { %v813_v17 = vpop.f32.mrf.mxu2 }
 0x659   :  { %v819_v18 = vadd.f32 %v813_v17, %v666_v16 }
 0x65b   :  { %v821_v19 = vadd.f32 %v819_v18, %v2154_v2  ;;  %v888_v2 = vld [vmem:[#allocation7 + $0x4f0] sm:$0xff] }
 0x65c   :  { %890 = vmatpush.msra.mxu3 %v888_v2  ;;  %v935_v2 = vld [vmem:[#allocation7 + $0x188] sm:$0xff] }
 0x65d   :  { %v823_v20 = vmul.f32 %v2139_v52, %v821_v19 }
 0x65e   :  { %891 = vmatpush.msra.mxu3 %v887_v34  ;;  %v934_v34 = vld [vmem:[#allocation7 + $0x138] sm:$0xff] }
 0x65f   :  { %825 = vadd.xlane.f32.xlu2 %v823_v20 }
 0x660   :  { %892 = vmatpush.msra.mxu3 %v886_v35  ;;  %v933_v35 = vld [vmem:[#allocation7 + $0xe8] sm:$0xff] }
 0x662   :  { %893 = vmatpush.msra.mxu3 %v885_v36  ;;  %v932_v36 = vld [vmem:[#allocation7 + $0x98] sm:$0xff] }
 0x664   :  { %894 = vmatpush.msra.mxu3 %v884_v37  ;;  %v931_v37 = vld [vmem:[#allocation7 + $0x48] sm:$0xff] }
 0x6c2   :  { %v816_v24 = vpop.f32.mrf.mxu2 }
 0x6c3   :  { %v820_v25 = vadd.f32 %v816_v24, %v667_v23  ;;  %v942_v24 = vld [vmem:[#allocation7 + $0x3b8] sm:$0xff] }
 0x6c4   :  { %952 = vmatpush.msrb.mxu1 %v942_v24  ;;  %v1110_v24 = vld [vmem:[#allocation7 + $0x918] sm:$0xff] }
 0x6c5   :  { %v822_v26 = vadd.f32 %v820_v25, %v2161_v6  ;;  %v883_v6 = vld [vmem:[#allocation7 + $0x360] sm:$0xff] }
 0x6c6   :  { %895 = vmatpush.msra.mxu3 %v883_v6  ;;  %v889_v6 = vperm.slane %v2171_v9, 4 }
 0x6c7   :  { %v824_v29 = vmul.f32 %v2139_v52, %v822_v26 }
 0x6c8   :  { %896 = vmatpush.msra.mxu3 %v882_v38 }
 0x6c9   :  { %827 = vadd.xlane.f32.xlu0 %v824_v29 }
 0x6ca   :  { %897 = vmatpush.msra.mxu3 %v881_v39 }
 0x6cc   :  { %898 = vmatpush.msra.mxu3 %v880_v41 }
 0x6ce   :  { %899 = vmatpush.msra.mxu3 %v879_v43 }
 0x6d0   :  { %900 = vmatpush.msra.mxu3 %v878_v46 }
 0x6d2   :  { %v826_v30 = vpop.xlane.xlu2 %825  ;;  %901 = vmatpush.msra.mxu3 %v877_v48 }
 0x6d3   :  { %v829_v32 = vmul.f32 0.03125, %v826_v30  ;;  %v940_v30 = vld [vmem:[#allocation7 + $0x318] sm:$0xff] }
 0x6d4   :  { %902 = vmatpush.msra.mxu3 %v876_v50 }
 0x6d5   :  { %v831_v28 = vsub.f32 %v821_v19, %v829_v32  ;;  %v939_v32 = vld [vmem:[#allocation7 + $0x2c8] sm:$0xff] }
 0x6d6   :  { %903 = vmatpush.msra.mxu3 %v875_v51 }
 0x6d7   :  { %v833_v31 = vmul.f32 %v2139_v52, %v831_v28  ;;  %v938_v28 = vld [vmem:[#allocation7 + $0x278] sm:$0xff] }
 0x6d8   :  { %904 = vmatpush.msra.mxu3 %v874_v53 }
 0x6d9   :  { %v835_v33 = vmul.f32 %v833_v31, %v833_v31 }
 0x6da   :  { %905 = vmatpush.msra.mxu3 %v873_v54 }
 0x6db   :  { %837 = vadd.xlane.f32.xlu1 %v835_v33  ;;  %v936_v33 = vld [vmem:[#allocation7 + $0x1d8] sm:$0xff] }
 0x73c   :  { %v828_v40 = vpop.xlane.xlu0 %827 }
 0x73d   :  { %v830_v42 = vmul.f32 0.03125, %v828_v40 }
 0x73f   :  { %v832_v44 = vsub.f32 %v822_v26, %v830_v42  ;;  %v941_v26 = vld [vmem:[#allocation7 + $0x368] sm:$0xff] }
 0x740   :  { %953 = vmatpush.msrb.mxu1 %v941_v26  ;;  %v1112_v26 = vld [vmem:[#allocation7 + $0x928] sm:$0xff] }
 0x741   :  { %v834_v47 = vmul.f32 %v2139_v52, %v832_v44 }
 0x742   :  { %954 = vmatpush.msrb.mxu1 %v940_v30  ;;  %v1104_v30 = vld [vmem:[#allocation7 + $0x8c8] sm:$0xff] }
 0x743   :  { %v836_v49 = vmul.f32 %v834_v47, %v834_v47 }
 0x744   :  { %955 = vmatpush.msrb.mxu1 %v939_v32  ;;  %v1105_v32 = vld [vmem:[#allocation7 + $0x8d0] sm:$0xff] }
 0x745   :  { %839 = vadd.xlane.f32.xlu2 %v836_v49 }
 0x746   :  { %956 = vmatpush.msrb.mxu1 %v938_v28  ;;  %v1106_v28 = vld [vmem:[#allocation7 + $0x8d8] sm:$0xff] }
 0x74e   :  { %v838_v55 = vpop.xlane.xlu1 %837 }
 0x74f   :  { %v841_v56 = vmul.f32 0.03125, %v838_v55 }
 0x751   :  { %v843_v57 = vadd.f32 1e-12, %v841_v56 }
 0x753   :  { %1899 = vrsqrt.f32 %v843_v57  ;;  %vm851_vm5 = vweird.f32 %v843_v57 }
 0x759   :  { %v1900_v58 = vpop.eup %1899 }
 0x75a   :  { %v846_v59 = vmul.f32 %v1900_v58, %v843_v57  ;;  %vm852_vm4 = vweird.f32 %v1900_v58 }
 0x75b   :  { %vm853_vm6 = vmor %vm851_vm5, %vm852_vm4 }
 0x75c   :  { %v847_v61 = vmul.f32 %v1900_v58, %v846_v59 }
 0x75e   :  { %v848_v62 = vmul.f32 0.5, %v847_v61 }
 0x760   :  { %v849_v63 = vsub.f32 1.5, %v848_v62 }
 0x762   :  { %v850_v0 = vmul.f32 %v1900_v58, %v849_v63  ;;  %v947_v63 = vperm.slane %v2171_v9, 5 }
 0x764   :  { %v854_v3 = vsel %vm853_vm6, %v1900_v58, %v850_v0 }
 0x765   :  { %v865_v4 = vmul.f32 %v854_v3, %v833_v31  ;;  %v937_v31 = vld [vmem:[#allocation7 + $0x228] sm:$0xff] }
 0x766   :  { %957 = vmatpush.msrb.mxu1 %v937_v31  ;;  %v1097_v31 = vld [vmem:[#allocation7 + $0x870] sm:$0xff] }
 0x767   :  { %v868_v5 = vmul.f32 %v867_v1, %v865_v4 }
 0x768   :  { %958 = vmatpush.msrb.mxu1 %v936_v33  ;;  %v1098_v33 = vld [vmem:[#allocation7 + $0x878] sm:$0xff] }
 0x769   :  { %v2210_v27 = vadd.f32 %v870_v22, %v868_v5 }
 0x76a   :  { %959 = vmatpush.msrb.mxu1 %v935_v2  ;;  %v1099_v2 = vld [vmem:[#allocation7 + $0x880] sm:$0xff] }
 0x76b   :  { %906 = vmatmul.f32.vlgmr.msra.gmra.mxu3 %v2210_v27 }
 0x76c   :  { %960 = vmatpush.msrb.mxu1 %v934_v34  ;;  %v1100_v34 = vld [vmem:[#allocation7 + $0x888] sm:$0xff] }
 0x76e   :  { %961 = vmatpush.msrb.mxu1 %v933_v35  ;;  %v1091_v35 = vld [vmem:[#allocation7 + $0x820] sm:$0xff] }
 0x770   :  { %962 = vmatpush.msrb.mxu1 %v932_v36  ;;  %v1092_v36 = vld [vmem:[#allocation7 + $0x828] sm:$0xff] }
 0x772   :  { %963 = vmatpush.msrb.mxu1 %v931_v37  ;;  %v1093_v37 = vld [vmem:[#allocation7 + $0x830] sm:$0xff] }
 0x7b8   :  { %v840_v11 = vpop.xlane.xlu2 %839 }
 0x7b9   :  { %v842_v12 = vmul.f32 0.03125, %v840_v11 }
 0x7bb   :  { %v844_v14 = vadd.f32 1e-12, %v842_v12 }
 0x7bd   :  { %1901 = vrsqrt.f32 %v844_v14  ;;  %vm861_vm8 = vweird.f32 %v844_v14 }
 0x7c3   :  { %v1902_v15 = vpop.eup %1901 }
 0x7c4   :  { %v856_v16 = vmul.f32 %v1902_v15, %v844_v14  ;;  %vm862_vm7 = vweird.f32 %v1902_v15  ;;  %v1121_v14 = vld [vmem:[#allocation7 + $0x9b0] sm:$0xff] }
 0x7c5   :  { %vm863_vm9 = vmor %vm861_vm8, %vm862_vm7  ;;  %1133 = vmatpush.msrb.mxu0 %v1121_v14  ;;  %v1045_v14 = vld [vmem:[#allocation7 + $0x5b0] sm:$0xff] }
 0x7c6   :  { %v857_v17 = vmul.f32 %v1902_v15, %v856_v16  ;;  %v1123_v16 = vld [vmem:[#allocation7 + $0x9c0] sm:$0xff] }
 0x7c7   :  { %1179 = vmatpush.msrb.mxu3 %v1123_v16  ;;  %v1037_v16 = vld [vmem:[#allocation7 + $0x550] sm:$0xff] }
 0x7c8   :  { %v858_v18 = vmul.f32 0.5, %v857_v17  ;;  %v1124_v17 = vld [vmem:[#allocation7 + $0x9c8] sm:$0xff] }
 0x7c9   :  { %1202 = vmatpush.msra.mxu1 %v1124_v17  ;;  %v1038_v17 = vld [vmem:[#allocation7 + $0x558] sm:$0xff] }
 0x7ca   :  { %v859_v19 = vsub.f32 1.5, %v858_v18  ;;  %v1115_v18 = vld [vmem:[#allocation7 + $0x960] sm:$0xff] }
 0x7cb   :  { %1134 = vmatpush.msrb.mxu0 %v1115_v18  ;;  %v1039_v18 = vld [vmem:[#allocation7 + $0x560] sm:$0xff] }
 0x7cc   :  { %v860_v20 = vmul.f32 %v1902_v15, %v859_v19  ;;  %v1116_v19 = vld [vmem:[#allocation7 + $0x968] sm:$0xff] }
 0x7ce   :  { %v864_v21 = vsel %vm863_vm9, %v1902_v15, %v860_v20  ;;  %v1122_v15 = vld [vmem:[#allocation7 + $0x9b8] sm:$0xff]  ;;  %v1117_v20 = vld [vmem:[#allocation7 + $0x970] sm:$0xff] }
 0x7cf   :  { %v866_v23 = vmul.f32 %v864_v21, %v834_v47  ;;  %1156 = vmatpush.msra.mxu2 %v1122_v15  ;;  %v1118_v21 = vld [vmem:[#allocation7 + $0x978] sm:$0xff]  ;;  %1180 = vmatpush.msrb.mxu3 %v1117_v20  ;;  %v1031_v20 = vld [vmem:[#allocation7 + $0x500] sm:$0xff] }
 0x7d0   :  { %1203 = vmatpush.msra.mxu1 %v1118_v21  ;;  %v1046_v15 = vld [vmem:[#allocation7 + $0x5b8] sm:$0xff]  ;;  %v1032_v21 = vld [vmem:[#allocation7 + $0x508] sm:$0xff] }
 0x7d1   :  { %v869_v25 = vmul.f32 %v867_v1, %v866_v23  ;;  %1157 = vmatpush.msra.mxu2 %v1116_v19  ;;  %v1109_v23 = vld [vmem:[#allocation7 + $0x910] sm:$0xff]  ;;  %v1040_v19 = vld [vmem:[#allocation7 + $0x568] sm:$0xff] }
 0x7d2   :  { %1135 = vmatpush.msrb.mxu0 %v1109_v23  ;;  %1204 = vmatpush.msra.mxu1 %v1112_v26  ;;  %v1033_v23 = vld [vmem:[#allocation7 + $0x510] sm:$0xff] }
 0x7d3   :  { %v872_v29 = vadd.f32 %v870_v22, %v869_v25  ;;  %v1111_v25 = vld [vmem:[#allocation7 + $0x920] sm:$0xff]  ;;  %1158 = vmatpush.msra.mxu2 %v1110_v24  ;;  %v1034_v24 = vld [vmem:[#allocation7 + $0x518] sm:$0xff] }
 0x7d4   :  { %1181 = vmatpush.msrb.mxu3 %v1111_v25  ;;  %1205 = vmatpush.msra.mxu1 %v1106_v28 }
 0x7d5   :  { %909 = vmatmul.f32.gmra.mxu3 %v872_v29  ;;  %1159 = vmatpush.msra.mxu2 %v1104_v30 }
 0x7d6   :  { %1182 = vmatpush.msrb.mxu3 %v1105_v32  ;;  %1206 = vmatpush.msra.mxu1 %v1100_v34  ;;  %v1017_v34 = vperm.slane %v2171_v9, 6  ;;  %v1025_v9 = vld [vmem:[#allocation8 + $0x38] sm:$0xff] }
 0x7d7   :  { %1160 = vmatpush.msra.mxu2 %v1098_v33 }
 0x7d8   :  { %1183 = vmatpush.msrb.mxu3 %v1099_v2 }
 0x7d9   :  { %1161 = vmatpush.msra.mxu2 %v1092_v36  ;;  %v2233_v36 = vld [vmem:[#allocation8] sm:$0xff] }
 0x7da   :  { %1184 = vmatpush.msrb.mxu3 %v1093_v37  ;;  %v1020_v37 = vperm.slane %v2233_v36, 7 }
 0x7ee   :  { %v907_v38 = vpop.f32.mrf.mxu3 }
 0x7ef   :  { %v908_v39 = vadd.f32 %v907_v38, %v889_v6  ;;  %v1085_v38 = vld [vmem:[#allocation7 + $0x7d0] sm:$0xff] }
 0x7f1   :  { %v915_v40 = vmul.f32 0.044715, %v908_v39  ;;  %v913_v47 = vmul.f32 0.5, %v908_v39 }
 0x7f3   :  { %v917_v41 = vmul.f32 %v915_v40, %v908_v39  ;;  %v1087_v40 = vld [vmem:[#allocation7 + $0x7e0] sm:$0xff] }
 0x7f4   :  { %1185 = vmatpush.msrb.mxu3 %v1087_v40  ;;  %v1125_v40 = vld [vmem:[#allocation7 + $0x9d0] sm:$0xff] }
 0x7f5   :  { %v919_v42 = vmul.f32 %v917_v41, %v908_v39  ;;  %v1088_v41 = vld [vmem:[#allocation7 + $0x7e8] sm:$0xff] }
 0x7f7   :  { %v921_v43 = vadd.f32 %v919_v42, %v908_v39  ;;  %v1086_v39 = vld [vmem:[#allocation7 + $0x7d8] sm:$0xff]  ;;  %v1079_v42 = vld [vmem:[#allocation7 + $0x780] sm:$0xff] }
 0x7f8   :  { %1162 = vmatpush.msra.mxu2 %v1086_v39 }
 0x7f9   :  { %v923_v44 = vmul.f32 0.7978846, %v921_v43  ;;  %v1080_v43 = vld [vmem:[#allocation7 + $0x788] sm:$0xff] }
 0x7fa   :  { %1163 = vmatpush.msra.mxu2 %v1080_v43  ;;  %v1113_v43 = vld [vmem:[#allocation7 + $0x930] sm:$0xff] }
 0x7fb   :  { %1903 = vtanh.f32 %v923_v44  ;;  %v1081_v44 = vld [vmem:[#allocation7 + $0x790] sm:$0xff] }
 0x7fc   :  { %1186 = vmatpush.msrb.mxu3 %v1081_v44  ;;  %v1114_v44 = vld [vmem:[#allocation7 + $0x938] sm:$0xff] }
 0x801   :  { %v1904_v46 = vpop.eup %1903 }
 0x802   :  { %v927_v48 = vadd.f32 1.0, %v1904_v46  ;;  %v1082_v46 = vld [vmem:[#allocation7 + $0x798] sm:$0xff] }
 0x804   :  { %v929_v49 = vmul.f32 %v927_v48, %v913_v47  ;;  %v1073_v48 = vld [vmem:[#allocation7 + $0x730] sm:$0xff] }
 0x806   :  { %964 = vmatmul.f32.vlgmr.msrb.gmra.mxu1 %v929_v49  ;;  %v1074_v49 = vld [vmem:[#allocation7 + $0x738] sm:$0xff] }
 0x807   :  { %1164 = vmatpush.msra.mxu2 %v1074_v49  ;;  %v1102_v49 = vld [vmem:[#allocation7 + $0x898] sm:$0xff] }
 0x858   :  { %v910_v50 = vpop.f32.mrf.mxu3 }
 0x859   :  { %v911_v51 = vadd.f32 %v910_v50, %v889_v6  ;;  %v1094_v6 = vld [vmem:[#allocation7 + $0x838] sm:$0xff]  ;;  %v1075_v50 = vld [vmem:[#allocation7 + $0x740] sm:$0xff] }
 0x85a   :  { %1207 = vmatpush.msra.mxu1 %v1094_v6  ;;  %1187 = vmatpush.msrb.mxu3 %v1075_v50  ;;  %v1095_v50 = vld [vmem:[#allocation7 + $0x840] sm:$0xff] }
 0x85b   :  { %v916_v53 = vmul.f32 0.044715, %v911_v51  ;;  %v914_v59 = vmul.f32 0.5, %v911_v51 }
 0x85c   :  { %1208 = vmatpush.msra.mxu1 %v1088_v41  ;;  %v1126_v41 = vld [vmem:[#allocation7 + $0x9d8] sm:$0xff] }
 0x85d   :  { %v918_v54 = vmul.f32 %v916_v53, %v911_v51  ;;  %v1076_v53 = vld [vmem:[#allocation7 + $0x748] sm:$0xff] }
 0x85e   :  { %1209 = vmatpush.msra.mxu1 %v1082_v46  ;;  %v1107_v46 = vld [vmem:[#allocation7 + $0x8e0] sm:$0xff] }
 0x85f   :  { %v920_v55 = vmul.f32 %v918_v54, %v911_v51  ;;  %v1067_v54 = vld [vmem:[#allocation7 + $0x6e0] sm:$0xff] }
 0x860   :  { %1210 = vmatpush.msra.mxu1 %v1076_v53  ;;  %v1089_v53 = vld [vmem:[#allocation7 + $0x7f0] sm:$0xff] }
 0x861   :  { %v922_v56 = vadd.f32 %v920_v55, %v911_v51  ;;  %v1068_v55 = vld [vmem:[#allocation7 + $0x6e8] sm:$0xff] }
 0x862   :  { %1165 = vmatpush.msra.mxu2 %v1068_v55  ;;  %v1083_v55 = vld [vmem:[#allocation7 + $0x7a0] sm:$0xff] }
 0x863   :  { %v924_v57 = vmul.f32 0.7978846, %v922_v56  ;;  %v1069_v56 = vld [vmem:[#allocation7 + $0x6f0] sm:$0xff] }
 0x864   :  { %1188 = vmatpush.msrb.mxu3 %v1069_v56  ;;  %v1084_v56 = vld [vmem:[#allocation7 + $0x7a8] sm:$0xff] }
 0x865   :  { %1905 = vtanh.f32 %v924_v57 }
 0x86b   :  { %v1906_v58 = vpop.eup %1905 }
 0x86c   :  { %v928_v61 = vadd.f32 1.0, %v1906_v58  ;;  %v1070_v58 = vld [vmem:[#allocation7 + $0x6f8] sm:$0xff] }
 0x86d   :  { %1211 = vmatpush.msra.mxu1 %v1070_v58  ;;  %v1078_v58 = vld [vmem:[#allocation7 + $0x758] sm:$0xff] }
 0x86e   :  { %v930_v62 = vmul.f32 %v928_v61, %v914_v59  ;;  %v1061_v59 = vld [vmem:[#allocation7 + $0x690] sm:$0xff]  ;;  %v1062_v61 = vld [vmem:[#allocation7 + $0x698] sm:$0xff] }
 0x86f   :  { %1166 = vmatpush.msra.mxu2 %v1062_v61  ;;  %v1072_v61 = vld [vmem:[#allocation7 + $0x708] sm:$0xff] }
 0x870   :  { %967 = vmatmul.f32.gmra.mxu1 %v930_v62  ;;  %v1063_v62 = vld [vmem:[#allocation7 + $0x6a0] sm:$0xff] }
 0x871   :  { %1189 = vmatpush.msrb.mxu3 %v1063_v62  ;;  %v1065_v62 = vld [vmem:[#allocation7 + $0x6b0] sm:$0xff] }
 0x883   :  { %v965_v0 = vpop.f32.mrf.mxu1 }
 0x884   :  { %v966_v1 = vadd.f32 %v965_v0, %v947_v63  ;;  %v1064_v0 = vld [vmem:[#allocation7 + $0x6a8] sm:$0xff] }
 0x885   :  { %1212 = vmatpush.msra.mxu1 %v1064_v0  ;;  %v1066_v0 = vld [vmem:[#allocation7 + $0x6b8] sm:$0xff] }
 0x886   :  { %v971_v3 = vadd.f32 %v966_v1, %v2210_v27  ;;  %v1055_v1 = vld [vmem:[#allocation7 + $0x640] sm:$0xff] }
 0x888   :  { %v973_v4 = vmul.f32 %v2139_v52, %v971_v3 }
 0x88a   :  { %975 = vadd.xlane.f32.xlu0 %v973_v4  ;;  %v1057_v4 = vld [vmem:[#allocation7 + $0x650] sm:$0xff] }
 0x88b   :  { %1190 = vmatpush.msrb.mxu3 %v1057_v4  ;;  %v1053_v4 = vld [vmem:[#allocation7 + $0x610] sm:$0xff] }
 0x8ed   :  { %v968_v22 = vpop.f32.mrf.mxu1 }
 0x8ee   :  { %v969_v5 = vadd.f32 %v968_v22, %v947_v63 }
 0x8f0   :  { %v2217_v7 = vadd.f32 %v969_v5, %v872_v29  ;;  %v1103_v29 = vld [vmem:[#allocation7 + $0x8c0] sm:$0xff]  ;;  %v1058_v5 = vld [vmem:[#allocation7 + $0x658] sm:$0xff] }
 0x8f1   :  { %1136 = vmatpush.msrb.mxu0 %v1103_v29  ;;  %1213 = vmatpush.msra.mxu1 %v1058_v5  ;;  %v1047_v5 = vld [vmem:[#allocation7 + $0x5c0] sm:$0xff] }
 0x8f2   :  { %v974_v8 = vmul.f32 %v2139_v52, %v2217_v7 }
 0x8f3   :  { %1137 = vmatpush.msrb.mxu0 %v1097_v31 }
 0x8f4   :  { %977 = vadd.xlane.f32.xlu1 %v974_v8  ;;  %v1050_v8 = vld [vmem:[#allocation7 + $0x5f8] sm:$0xff] }
 0x8f5   :  { %1138 = vmatpush.msrb.mxu0 %v1091_v35 }
 0x8f7   :  { %1139 = vmatpush.msrb.mxu0 %v1085_v38 }
 0x8f9   :  { %1140 = vmatpush.msrb.mxu0 %v1079_v42  ;;  %v1120_v42 = vld [vmem:[#allocation7 + $0x988] sm:$0xff] }
 0x8fb   :  { %1141 = vmatpush.msrb.mxu0 %v1073_v48  ;;  %v1101_v48 = vld [vmem:[#allocation7 + $0x890] sm:$0xff] }
 0x8fd   :  { %v976_v10 = vpop.xlane.xlu0 %975  ;;  %1142 = vmatpush.msrb.mxu0 %v1067_v54  ;;  %v1090_v54 = vld [vmem:[#allocation7 + $0x7f8] sm:$0xff] }
 0x8fe   :  { %v979_v11 = vmul.f32 0.03125, %v976_v10  ;;  %v1051_v10 = vld [vmem:[#allocation7 + $0x600] sm:$0xff] }
 0x8ff   :  { %1143 = vmatpush.msrb.mxu0 %v1061_v59  ;;  %1191 = vmatpush.msrb.mxu3 %v1051_v10  ;;  %v1071_v59 = vld [vmem:[#allocation7 + $0x700] sm:$0xff]  ;;  %v1041_v10 = vld [vmem:[#allocation7 + $0x570] sm:$0xff] }
 0x900   :  { %v981_v12 = vsub.f32 %v971_v3, %v979_v11  ;;  %v1056_v3 = vld [vmem:[#allocation7 + $0x648] sm:$0xff] }
 0x901   :  { %1144 = vmatpush.msrb.mxu0 %v1055_v1  ;;  %1167 = vmatpush.msra.mxu2 %v1056_v3  ;;  %v1052_v11 = vld [vmem:[#allocation7 + $0x608] sm:$0xff]  ;;  %v1059_v1 = vld [vmem:[#allocation7 + $0x660] sm:$0xff] }
 0x902   :  { %v2222_v13 = vmul.f32 %v2139_v52, %v981_v12  ;;  %v1043_v12 = vld [vmem:[#allocation7 + $0x5a0] sm:$0xff]  ;;  %1214 = vmatpush.msra.mxu1 %v1052_v11  ;;  %1192 = vmatpush.msrb.mxu3 %v1045_v14  ;;  %v1060_v3 = vld [vmem:[#allocation7 + $0x668] sm:$0xff]  ;;  %v1042_v11 = vld [vmem:[#allocation7 + $0x578] sm:$0xff] }
 0x903   :  { %1168 = vmatpush.msra.mxu2 %v1050_v8  ;;  %v1036_v14 = vld [vmem:[#allocation7 + $0x528] sm:$0xff] }
 0x904   :  { %v985_v27 = vmul.f32 %v2222_v13, %v2222_v13  ;;  %1215 = vmatpush.msra.mxu1 %v1046_v15  ;;  %1193 = vmatpush.msrb.mxu3 %v1039_v18 }
 0x906   :  { %987 = vadd.xlane.f32.xlu2 %v985_v27  ;;  %v1044_v27 = vld [vmem:[#allocation7 + $0x5a8] sm:$0xff]  ;;  %1216 = vmatpush.msra.mxu1 %v1040_v19 }
 0x907   :  { %1169 = vmatpush.msra.mxu2 %v1044_v27  ;;  %1194 = vmatpush.msrb.mxu3 %v1033_v23  ;;  %v1035_v27 = vld [vmem:[#allocation7 + $0x520] sm:$0xff] }
 0x908   :  { %1217 = vmatpush.msra.mxu1 %v1034_v24 }
 0x909   :  { %1170 = vmatpush.msra.mxu2 %v1038_v17 }
 0x90b   :  { %1171 = vmatpush.msra.mxu2 %v1032_v21 }
 0x90d   :  { %1248 = vmatpush.msrb.mxu2 %v1126_v41 }
 0x90f   :  { %1249 = vmatpush.msrb.mxu2 %v1120_v42 }
 0x911   :  { %1250 = vmatpush.msrb.mxu2 %v1114_v44 }
 0x967   :  { %v978_v47 = vpop.xlane.xlu1 %977 }
 0x968   :  { %v980_v51 = vmul.f32 0.03125, %v978_v47  ;;  %v1108_v47 = vld [vmem:[#allocation7 + $0x8e8] sm:$0xff] }
 0x969   :  { %1251 = vmatpush.msrb.mxu2 %v1108_v47 }
 0x96a   :  { %v982_v57 = vsub.f32 %v2217_v7, %v980_v51  ;;  %v1049_v7 = vld [vmem:[#allocation7 + $0x5f0] sm:$0xff]  ;;  %v1096_v51 = vld [vmem:[#allocation7 + $0x848] sm:$0xff] }
 0x96b   :  { %1145 = vmatpush.msrb.mxu0 %v1049_v7  ;;  %1252 = vmatpush.msrb.mxu2 %v1102_v49  ;;  %v1048_v7 = vld [vmem:[#allocation7 + $0x5c8] sm:$0xff] }
 0x96c   :  { %v2228_v63 = vmul.f32 %v2139_v52, %v982_v57  ;;  %v1077_v57 = vld [vmem:[#allocation7 + $0x750] sm:$0xff] }
 0x96d   :  { %1146 = vmatpush.msrb.mxu0 %v1043_v12  ;;  %1253 = vmatpush.msrb.mxu2 %v1096_v51 }
 0x96e   :  { %v986_v22 = vmul.f32 %v2228_v63, %v2228_v63 }
 0x96f   :  { %1147 = vmatpush.msrb.mxu0 %v1037_v16  ;;  %1254 = vmatpush.msrb.mxu2 %v1090_v54 }
 0x970   :  { %989 = vadd.xlane.f32.xlu0 %v986_v22  ;;  %v1054_v22 = vld [vmem:[#allocation7 + $0x618] sm:$0xff] }
 0x971   :  { %1148 = vmatpush.msrb.mxu0 %v1031_v20  ;;  %1255 = vmatpush.msrb.mxu2 %v1084_v56 }
 0x973   :  { %1225 = vmatpush.msra.mxu0 %v1125_v40  ;;  %1256 = vmatpush.msrb.mxu2 %v1078_v58 }
 0x975   :  { %1257 = vmatpush.msrb.mxu2 %v1072_v61 }
 0x977   :  { %1258 = vmatpush.msrb.mxu2 %v1066_v0 }
 0x979   :  { %v988_v25 = vpop.xlane.xlu2 %987  ;;  %1259 = vmatpush.msrb.mxu2 %v1060_v3 }
 0x97a   :  { %v991_v26 = vmul.f32 0.03125, %v988_v25 }
 0x97b   :  { %1260 = vmatpush.msrb.mxu2 %v1054_v22 }
 0x97c   :  { %v993_v29 = vadd.f32 1e-12, %v991_v26 }
 0x97d   :  { %1261 = vmatpush.msrb.mxu2 %v1048_v7 }
 0x97e   :  { %1907 = vrsqrt.f32 %v993_v29  ;;  %vm1001_vm11 = vweird.f32 %v993_v29 }
 0x97f   :  { %1262 = vmatpush.msrb.mxu2 %v1042_v11  ;;  %v1029_v11 = vld [vmem:[#allocation8 + $0x58] sm:$0xff] }
 0x981   :  { %1263 = vmatpush.msrb.mxu2 %v1036_v14 }
 0x984   :  { %v1908_v30 = vpop.eup %1907 }
 0x985   :  { %v996_v32 = vmul.f32 %v1908_v30, %v993_v29  ;;  %vm1002_vm10 = vweird.f32 %v1908_v30  ;;  %v2262_v29 = vld [vmem:[#allocation8 + $0x30] sm:$0xff] }
 0x986   :  { %vm1003_vm12 = vmor %vm1001_vm11, %vm1002_vm10 }
 0x987   :  { %v997_v28 = vmul.f32 %v1908_v30, %v996_v32 }
 0x989   :  { %v998_v31 = vmul.f32 0.5, %v997_v28  ;;  %v1127_v28 = vperm.slane %v2262_v29, 0 }
 0x98b   :  { %v999_v33 = vsub.f32 1.5, %v998_v31 }
 0x98d   :  { %v1000_v2 = vmul.f32 %v1908_v30, %v999_v33 }
 0x98f   :  { %v1004_v35 = vsel %vm1003_vm12, %v1908_v30, %v1000_v2  ;;  %v1128_v30 = vperm.slane %v1025_v9, 0  ;;  %v1393_v9 = vld [vmem:[#allocation7 + $0x850] sm:$0xff]  ;;  %vm1783_vm12 = vcmask 1040384  }
 0x990   :  { %v1015_v6 = vmul.f32 %v1004_v35, %v2222_v13  ;;  %v1119_v13 = vld [vmem:[#allocation7 + $0x980] sm:$0xff] }
 0x991   :  { %1226 = vmatpush.msra.mxu0 %v1119_v13 }
 0x992   :  { %v1018_v38 = vmul.f32 %v1017_v34, %v1015_v6  ;;  %v1028_v6 = vld [vmem:[#allocation8 + $0x50] sm:$0xff] }
 0x993   :  { %1227 = vmatpush.msra.mxu0 %v1113_v43 }
 0x994   :  { %v2241_v39 = vadd.f32 %v1020_v37, %v1018_v38  ;;  %v1131_v38 = vperm.slane %v1028_v6, 0 }
 0x995   :  { %1228 = vmatpush.msra.mxu0 %v1107_v46 }
 0x996   :  { %1149 = vmatmul.f32.vlgmr.msrb.gmra.mxu0 %v2241_v39  ;;  %1172 = vmatmul.f32.vlgmr.msra.gmra.mxu2 %v2241_v39 }
 0x997   :  { %1195 = vmatmul.f32.vlgmr.msrb.gmra.mxu3 %v2241_v39  ;;  %1218 = vmatmul.f32.vlgmr.msra.gmra.mxu1 %v2241_v39 }
 0x998   :  { %1229 = vmatpush.msra.mxu0 %v1101_v48 }
 0x99a   :  { %1230 = vmatpush.msra.mxu0 %v1095_v50 }
 0x99c   :  { %1231 = vmatpush.msra.mxu0 %v1089_v53 }
 0x99e   :  { %1232 = vmatpush.msra.mxu0 %v1083_v55 }
 0x9a0   :  { %1233 = vmatpush.msra.mxu0 %v1077_v57 }
 0x9a2   :  { %1234 = vmatpush.msra.mxu0 %v1071_v59 }
 0x9a4   :  { %1235 = vmatpush.msra.mxu0 %v1065_v62 }
 0x9a6   :  { %1236 = vmatpush.msra.mxu0 %v1059_v1 }
 0x9a8   :  { %1237 = vmatpush.msra.mxu0 %v1053_v4 }
 0x9aa   :  { %1238 = vmatpush.msra.mxu0 %v1047_v5 }
 0x9ac   :  { %1239 = vmatpush.msra.mxu0 %v1041_v10 }
 0x9ae   :  { %1240 = vmatpush.msra.mxu0 %v1035_v27 }
 0x9e3   :  { %v990_v8 = vpop.xlane.xlu0 %989 }
 0x9e4   :  { %v992_v12 = vmul.f32 0.03125, %v990_v8 }
 0x9e6   :  { %v994_v15 = vadd.f32 1e-12, %v992_v12  ;;  %v1132_v12 = vperm.slane %v1029_v11, 0  ;;  %v1546_v11 = vld [vmem:[#allocation7 + $0x808] sm:$0xff] }
 0x9e8   :  { %1909 = vrsqrt.f32 %v994_v15  ;;  %vm1011_vm14 = vweird.f32 %v994_v15 }
 0x9ee   :  { %v1910_v16 = vpop.eup %1909 }
 0x9ef   :  { %v1006_v17 = vmul.f32 %v1910_v16, %v994_v15  ;;  %vm1012_vm13 = vweird.f32 %v1910_v16 }
 0x9f0   :  { %vm1013_vm15 = vmor %vm1011_vm14, %vm1012_vm13 }
 0x9f1   :  { %v1007_v18 = vmul.f32 %v1910_v16, %v1006_v17 }
 0x9f3   :  { %v1008_v19 = vmul.f32 0.5, %v1007_v18 }
 0x9f5   :  { %v1009_v20 = vsub.f32 1.5, %v1008_v19 }
 0x9f7   :  { %v1010_v21 = vmul.f32 %v1910_v16, %v1009_v20  ;;  %v1398_v20 = vld [vmem:[#allocation7 + $0x9e0] sm:$0xff] }
 0x9f8   :  { %1399 = vmatpush.msrb.mxu0 %v1398_v20  ;;  %v1538_v20 = vld [vmem:[#allocation7 + $0x588] sm:$0xff] }
 0x9f9   :  { %v1014_v23 = vsel %vm1013_vm15, %v1910_v16, %v1010_v21  ;;  %v1027_v16 = vld [vmem:[#allocation8 + $0x48] sm:$0xff]  ;;  %v1397_v21 = vld [vmem:[#allocation7 + $0x990] sm:$0xff] }
 0x9fa   :  { %v1016_v24 = vmul.f32 %v1014_v23, %v2228_v63  ;;  %v1026_v63 = vld [vmem:[#allocation8 + $0x40] sm:$0xff]  ;;  %v1130_v18 = vperm.slane %v1027_v16, 0  ;;  %1400 = vmatpush.msrb.mxu0 %v1397_v21  ;;  %v1541_v16 = vld [vmem:[#allocation7 + $0x678] sm:$0xff] }
 0x9fb   :  { %v1129_v32 = vperm.slane %v1026_v63, 0  ;;  %v1396_v23 = vld [vmem:[#allocation7 + $0x940] sm:$0xff] }
 0x9fc   :  { %v1019_v25 = vmul.f32 %v1017_v34, %v1016_v24  ;;  %v1395_v24 = vld [vmem:[#allocation7 + $0x8f0] sm:$0xff]  ;;  %1401 = vmatpush.msrb.mxu0 %v1396_v23  ;;  %v1392_v63 = vld [vmem:[#allocation7 + $0x800] sm:$0xff] }
 0x9fe   :  { %v2252_v26 = vadd.f32 %v1020_v37, %v1019_v25  ;;  %1402 = vmatpush.msrb.mxu0 %v1395_v24  ;;  %v1394_v25 = vld [vmem:[#allocation7 + $0x8a0] sm:$0xff]  ;;  %v1537_v24 = vld [vmem:[#allocation7 + $0x538] sm:$0xff] }
 0xa00   :  { %1152 = vmatmul.f32.gmra.mxu0 %v2252_v26  ;;  %1175 = vmatmul.f32.gmra.mxu2 %v2252_v26 }
 0xa01   :  { %1198 = vmatmul.f32.gmra.mxu3 %v2252_v26  ;;  %1221 = vmatmul.f32.gmra.mxu1 %v2252_v26 }
 0xa02   :  { %1403 = vmatpush.msrb.mxu0 %v1394_v25 }
 0xa04   :  { %1404 = vmatpush.msrb.mxu0 %v1393_v9 }
 0xa06   :  { %1405 = vmatpush.msrb.mxu0 %v1392_v63  ;;  %v1422_v63 = vperm.slane %v2262_v29, 1 }
 0xa08   :  { %1241 = vmatmul.f32.vlgmr.msra.gmra.mxu0 %v2241_v39  ;;  %1264 = vmatmul.f32.vlgmr.msrb.gmra.mxu2 %v2241_v39 }
 0xa10   :  { %1244 = vmatmul.f32.gmra.mxu0 %v2252_v26  ;;  %1267 = vmatmul.f32.gmra.mxu2 %v2252_v26 }
 0xa13   :  { %v1150_v33 = vpop.f32.mrf.mxu0 }
 0xa14   :  { %v1151_v36 = vadd.f32 %v1150_v33, %v1127_v28  ;;  %v1219_v54 = vpop.f32.mrf.mxu1  ;;  %v1387_v33 = vld [vmem:[#allocation7 + $0x670] sm:$0xff] }
 0xa15   :  { %v1220_v19 = vadd.f32 %v1219_v54, %v1130_v18 }
 0xa19   :  { %v1173_v31 = vpop.f32.mrf.mxu2 }
 0xa1a   :  { %v1174_v2 = vadd.f32 %v1173_v31, %v1128_v30  ;;  %v1196_v34 = vpop.f32.mrf.mxu3  ;;  %v1388_v31 = vld [vmem:[#allocation7 + $0x6c0] sm:$0xff] }
 0xa1b   :  { %v1197_v35 = vadd.f32 %v1196_v34, %v1129_v32  ;;  %v1386_v34 = vld [vmem:[#allocation7 + $0x620] sm:$0xff] }
 0xa1c   :  { %1286 = vmatpush.xpose.msra.mxu3 %v1174_v2 }
 0xa1f   :  { %1287 = vmatmul.f32.vlgmr.msra.gmra.mxu3 %v1151_v36  ;;  %v1384_v36 = vld [vmem:[#allocation7 + $0x580] sm:$0xff] }
 0xa20   :  { %1355 = vmatpush.msrb.mxu3 %v1197_v35  ;;  %v1385_v35 = vld [vmem:[#allocation7 + $0x5d0] sm:$0xff] }
 0xa7d   :  { %v1153_v37 = vpop.f32.mrf.mxu0 }
 0xa7e   :  { %v1154_v46 = vadd.f32 %v1153_v37, %v1127_v28  ;;  %v2267_v55 = vpop.f32.mrf.mxu1  ;;  %v1389_v28 = vld [vmem:[#allocation7 + $0x710] sm:$0xff] }
 0xa83   :  { %v1176_v40 = vpop.f32.mrf.mxu2 }
 0xa84   :  { %v1177_v41 = vadd.f32 %v1176_v40, %v1128_v30  ;;  %v1199_v13 = vpop.f32.mrf.mxu3  ;;  %v1391_v30 = vld [vmem:[#allocation7 + $0x7b0] sm:$0xff] }
 0xa85   :  { %v1200_v42 = vadd.f32 %v1199_v13, %v1129_v32  ;;  %v1242_v43 = vpop.f32.mrf.mxu0  ;;  %v1390_v32 = vld [vmem:[#allocation7 + $0x760] sm:$0xff]  ;;  %1406 = vmatpush.msrb.mxu0 %v1391_v30  ;;  %v1223_v13 = vadd.f32 %v2267_v55, %v1130_v18  ;;  %v1540_v18 = vld [vmem:[#allocation7 + $0x628] sm:$0xff] }
 0xa86   :  { %v1243_v44 = vadd.f32 %v1242_v43, %v1131_v38  ;;  %1306 = vmatpush.xpose.msrb.mxu1 %v1177_v41  ;;  %v1383_v41 = vld [vmem:[#allocation7 + $0x530] sm:$0xff] }
 0xa87   :  { %1407 = vmatpush.msrb.mxu0 %v1390_v32 }
 0xa88   :  { %1440 = vmatpush.xpose.msra.mxu3 %v1243_v44 }
 0xa89   :  { %1307 = vmatmul.f32.vlgmr.msrb.gmra.mxu1 %v1154_v46  ;;  %1408 = vmatpush.msrb.mxu0 %v1389_v28 }
 0xa8a   :  { %1378 = vmatpush.msra.mxu1 %v1200_v42 }
 0xa8b   :  { %v1265_v27 = vpop.f32.mrf.mxu2  ;;  %1409 = vmatpush.msrb.mxu0 %v1388_v31 }
 0xa8c   :  { %v1266_v17 = vadd.f32 %v1265_v27, %v1132_v12  ;;  %v1544_v27 = vld [vmem:[#allocation7 + $0x768] sm:$0xff] }
 0xa8d   :  { %v1245_v47 = vpop.f32.mrf.mxu0  ;;  %1410 = vmatpush.msrb.mxu0 %v1387_v33 }
 0xa8e   :  { %v1246_v48 = vadd.f32 %v1245_v47, %v1131_v38 }
 0xa8f   :  { %1411 = vmatpush.msrb.mxu0 %v1386_v34 }
 0xa90   :  { %1460 = vmatpush.xpose.msrb.mxu1 %v1246_v48 }
 0xa91   :  { %1412 = vmatpush.msrb.mxu0 %v1385_v35 }
 0xa93   :  { %v1268_v37 = vpop.f32.mrf.mxu2  ;;  %1413 = vmatpush.msrb.mxu0 %v1384_v36 }
 0xa94   :  { %v1269_v40 = vadd.f32 %v1268_v37, %v1132_v12  ;;  %v1545_v12 = vld [vmem:[#allocation7 + $0x7b8] sm:$0xff] }
 0xa95   :  { %1414 = vmatpush.msrb.mxu0 %v1383_v41 }
 0xaa2   :  { %v1288_v49 = vpop.f32.mrf.mxu3 }
 0xaa3   :  { %v1311_v50 = vmul.f32 0.25, %v1288_v49 }
 0xaa5   :  { %v1313_v51 = vadd.f32 %v1311_v50, %v2179_v45 }
 0xaa7   :  { %v1315_v53 = vsel %vm557_vm3, %v1313_v51, -inf }
 0xaa8   :  { %1316 = vmax.xlane.f32.xlu1 %v1315_v53 }
 0xb06   :  { %v1308_v56 = vpop.f32.mrf.mxu1 }
 0xb07   :  { %v1312_v57 = vmul.f32 0.25, %v1308_v56 }
 0xb09   :  { %v1314_v58 = vadd.f32 %v1312_v57, %v2184_v60 }
 0xb0b   :  { %v1318_v59 = vsel %vm557_vm3, %v1314_v58, -inf }
 0xb0c   :  { %1319 = vmax.xlane.f32.xlu2 %v1318_v59 }
 0xb1b   :  { %v1317_v61 = vpop.xlane.xlu1 %1316 }
 0xb1c   :  { %v1321_v62 = vsub.f32 %v1313_v51, %v1317_v61 }
 0xb1e   :  { %v1323_v0 = vmul.f32 1.442695, %v1321_v62 }
 0xb20   :  { %1911 = vpow2.f32 %v1323_v0 }
 0xb26   :  { %v1912_v1 = vpop.eup %1911 }
 0xb27   :  { %v1327_v3 = vsel %vm557_vm3, %v1912_v1, 0.0 }
 0xb28   :  { %1328 = vadd.xlane.f32.xlu0 %v1327_v3 }
 0xb7f   :  { %v1320_v4 = vpop.xlane.xlu2 %1319 }
 0xb80   :  { %v1322_v22 = vsub.f32 %v1314_v58, %v1320_v4  ;;  %v1552_v4 = vld [vmem:[#allocation7 + $0x9e8] sm:$0xff] }
 0xb81   :  { %1553 = vmatpush.msra.mxu2 %v1552_v4 }
 0xb82   :  { %v1325_v5 = vmul.f32 1.442695, %v1322_v22  ;;  %v1551_v22 = vld [vmem:[#allocation7 + $0x998] sm:$0xff] }
 0xb83   :  { %1554 = vmatpush.msra.mxu2 %v1551_v22 }
 0xb84   :  { %1913 = vpow2.f32 %v1325_v5  ;;  %v1550_v5 = vld [vmem:[#allocation7 + $0x948] sm:$0xff] }
 0xb85   :  { %1555 = vmatpush.msra.mxu2 %v1550_v5 }
 0xb8a   :  { %v1914_v7 = vpop.eup %1913 }
 0xb8b   :  { %v1330_v8 = vsel %vm557_vm3, %v1914_v7, 0.0 }
 0xb8c   :  { %1331 = vadd.xlane.f32.xlu1 %v1330_v8  ;;  %v1548_v8 = vld [vmem:[#allocation7 + $0x8a8] sm:$0xff] }
 0xb9b   :  { %v1329_v10 = vpop.xlane.xlu0 %1328 }
 0xb9c   :  { %1915 = vrcp.f32 %v1329_v10  ;;  %v1547_v10 = vld [vmem:[#allocation7 + $0x858] sm:$0xff] }
 0xba2   :  { %v1916_v14 = vpop.eup %1915 }
 0xba3   :  { %v1335_v15 = vmul.f32 %v1916_v14, %v1912_v1  ;;  %v1543_v14 = vld [vmem:[#allocation7 + $0x718] sm:$0xff] }
 0xba5   :  { %1859 = vmatmul.msk.f32.vlgmr.msrb.gmra.mxu3 %vm557_vm3, %v1335_v15  ;;  %v1542_v15 = vld [vmem:[#allocation7 + $0x6c8] sm:$0xff] }
 0xba6   :  { %1509 = vmatpush.msrb.mxu3 %v1266_v17 }
 0xbad   :  { %1441 = vmatmul.f32.vlgmr.msra.gmra.mxu3 %v1220_v19  ;;  %v1539_v19 = vld [vmem:[#allocation7 + $0x5d8] sm:$0xff] }
 0xbff   :  { %v1332_v2 = vpop.xlane.xlu1 %1331 }
 0xc00   :  { %1917 = vrcp.f32 %v1332_v2 }
 0xc06   :  { %v1918_v6 = vpop.eup %1917 }
 0xc07   :  { %v1336_v38 = vmul.f32 %v1918_v6, %v1914_v7  ;;  %v1549_v7 = vld [vmem:[#allocation7 + $0x8f8] sm:$0xff] }
 0xc08   :  { %1556 = vmatpush.msra.mxu2 %v1549_v7 }
 0xc09   :  { %1860 = vmatmul.msk.f32.vlgmr.msra.gmra.mxu1 %vm557_vm3, %v1336_v38 }
 0xc0a   :  { %1532 = vmatpush.msra.mxu1 %v1269_v40  ;;  %1557 = vmatpush.msra.mxu2 %v1548_v8 }
 0xc0c   :  { %1558 = vmatpush.msra.mxu2 %v1547_v10 }
 0xc0e   :  { %1559 = vmatpush.msra.mxu2 %v1546_v11 }
 0xc10   :  { %1560 = vmatpush.msra.mxu2 %v1545_v12  ;;  %v1624_v12 = vperm.slane %v2262_v29, 2 }
 0xc11   :  { %1461 = vmatmul.f32.vlgmr.msrb.gmra.mxu1 %v1223_v13 }
 0xc12   :  { %1561 = vmatpush.msra.mxu2 %v1544_v27 }
 0xc14   :  { %1562 = vmatpush.msra.mxu2 %v1543_v14 }
 0xc16   :  { %1563 = vmatpush.msra.mxu2 %v1542_v15  ;;  %v1627_v15 = vperm.slane %v2262_v29, 3 }
 0xc18   :  { %1564 = vmatpush.msra.mxu2 %v1541_v16 }
 0xc1a   :  { %1565 = vmatpush.msra.mxu2 %v1540_v18  ;;  %v1703_v18 = vld [vmem:[#allocation7 + $0x9f8] sm:$0xff] }
 0xc1b   :  { %1705 = vmatpush.msrb.mxu1 %v1703_v18 }
 0xc1c   :  { %1566 = vmatpush.msra.mxu2 %v1539_v19  ;;  %v1702_v19 = vld [vmem:[#allocation7 + $0x9a8] sm:$0xff] }
 0xc1d   :  { %1706 = vmatpush.msrb.mxu1 %v1702_v19 }
 0xc1e   :  { %1567 = vmatpush.msra.mxu2 %v1538_v20  ;;  %v1701_v20 = vld [vmem:[#allocation7 + $0x958] sm:$0xff] }
 0xc1f   :  { %1707 = vmatpush.msrb.mxu1 %v1701_v20 }
 0xc20   :  { %1568 = vmatpush.msra.mxu2 %v1537_v24  ;;  %v1700_v24 = vld [vmem:[#allocation7 + $0x908] sm:$0xff] }
 0xc21   :  { %1708 = vmatpush.msrb.mxu1 %v1700_v24 }
 0xc28   :  { %v1357_v42 = vpop.f32.mrf.mxu3 }
 0xc29   :  { %1415 = vmatmul.f32.vlgmr.msrb.gmra.mxu0 %v1357_v42 }
 0xc30   :  { %v1442_v43 = vpop.f32.mrf.mxu3 }
 0xc31   :  { %v1465_v44 = vmul.f32 0.25, %v1442_v43 }
 0xc33   :  { %v1467_v46 = vadd.f32 %v1465_v44, %v2179_v45  ;;  %v1644_v44 = vld [vmem:[#allocation7 + $0x9a0] sm:$0xff] }
 0xc35   :  { %v1469_v47 = vsel %vm557_vm3, %v1467_v46, -inf }
 0xc36   :  { %1470 = vmax.xlane.f32.xlu2 %v1469_v47 }
 0xc86   :  { %v1380_v48 = vpop.f32.mrf.mxu1 }
 0xc87   :  { %1418 = vmatmul.f32.gmra.mxu0 %v1380_v48 }
 0xc8e   :  { %v1462_v49 = vpop.f32.mrf.mxu1 }
 0xc8f   :  { %v1466_v50 = vmul.f32 0.25, %v1462_v49 }
 0xc91   :  { %v1468_v51 = vadd.f32 %v1466_v50, %v2184_v60 }
 0xc93   :  { %v1472_v53 = vsel %vm557_vm3, %v1468_v51, -inf }
 0xc94   :  { %1473 = vmax.xlane.f32.xlu0 %v1472_v53  ;;  %v1641_v53 = vld [vmem:[#allocation7 + $0x8b0] sm:$0xff] }
 0xca6   :  { %v1416_v30 = vpop.f32.mrf.mxu0 }
 0xca7   :  { %v1423_v32 = vadd.f32 %v1422_v63, %v1416_v30 }
 0xca9   :  { %v1471_v54 = vpop.xlane.xlu2 %1470 }
 0xcaa   :  { %v1475_v55 = vsub.f32 %v1467_v46, %v1471_v54  ;;  %v1640_v54 = vld [vmem:[#allocation7 + $0x860] sm:$0xff] }
 0xcac   :  { %v1477_v56 = vmul.f32 1.442695, %v1475_v55  ;;  %v1639_v55 = vld [vmem:[#allocation7 + $0x810] sm:$0xff] }
 0xcae   :  { %1919 = vpow2.f32 %v1477_v56  ;;  %v1638_v56 = vld [vmem:[#allocation7 + $0x7c0] sm:$0xff] }
 0xcb4   :  { %v1920_v57 = vpop.eup %1919 }
 0xcb5   :  { %v1481_v58 = vsel %vm557_vm3, %v1920_v57, 0.0 }
 0xcb6   :  { %1482 = vadd.xlane.f32.xlu1 %v1481_v58  ;;  %v1636_v58 = vld [vmem:[#allocation7 + $0x720] sm:$0xff] }
 0xd04   :  { %v1419_v34 = vpop.f32.mrf.mxu0 }
 0xd05   :  { %v1424_v35 = vadd.f32 %v1422_v63, %v1419_v34 }
 0xd07   :  { %v1474_v45 = vpop.xlane.xlu0 %1473 }
 0xd08   :  { %v1476_v59 = vsub.f32 %v1468_v51, %v1474_v45  ;;  %v1642_v51 = vld [vmem:[#allocation7 + $0x900] sm:$0xff]  ;;  %v1635_v45 = vld [vmem:[#allocation7 + $0x6d0] sm:$0xff] }
 0xd0a   :  { %v1479_v61 = vmul.f32 1.442695, %v1476_v59  ;;  %v1634_v59 = vld [vmem:[#allocation7 + $0x680] sm:$0xff] }
 0xd0c   :  { %1921 = vpow2.f32 %v1479_v61  ;;  %v1633_v61 = vld [vmem:[#allocation7 + $0x630] sm:$0xff] }
 0xd12   :  { %v1922_v62 = vpop.eup %1921 }
 0xd13   :  { %v1484_v0 = vsel %vm557_vm3, %v1922_v62, 0.0 }
 0xd14   :  { %1485 = vadd.xlane.f32.xlu2 %v1484_v0  ;;  %v1631_v0 = vld [vmem:[#allocation7 + $0x590] sm:$0xff] }
 0xd29   :  { %v1483_v60 = vpop.xlane.xlu1 %1482 }
 0xd2a   :  { %1923 = vrcp.f32 %v1483_v60  ;;  %v1630_v60 = vld [vmem:[#allocation7 + $0x540] sm:$0xff] }
 0xd30   :  { %v1924_v1 = vpop.eup %1923 }
 0xd31   :  { %v1489_v3 = vmul.f32 %v1924_v1, %v1920_v57  ;;  %v1637_v57 = vld [vmem:[#allocation7 + $0x770] sm:$0xff] }
 0xd33   :  { %1861 = vmatmul.msk.f32.vlgmr.msrb.gmra.mxu3 %vm557_vm3, %v1489_v3 }
 0xd87   :  { %v1486_v17 = vpop.xlane.xlu2 %1485 }
 0xd88   :  { %1925 = vrcp.f32 %v1486_v17 }
 0xd8e   :  { %v1926_v21 = vpop.eup %1925 }
 0xd8f   :  { %v1490_v23 = vmul.f32 %v1926_v21, %v1922_v62  ;;  %v1632_v62 = vld [vmem:[#allocation7 + $0x5e0] sm:$0xff] }
 0xd91   :  { %1862 = vmatmul.msk.f32.vlgmr.msra.gmra.mxu1 %vm557_vm3, %v1490_v23 }
 0xdb6   :  { %v1511_v25 = vpop.f32.mrf.mxu3 }
 0xdb7   :  { %1569 = vmatmul.f32.vlgmr.msra.gmra.mxu2 %v1511_v25 }
 0xe0e   :  { %v1534_v9 = vpop.f32.mrf.mxu1 }
 0xe0f   :  { %1572 = vmatmul.f32.gmra.mxu2 %v1534_v9 }
 0xe3a   :  { %v1570_v28 = vpop.f32.mrf.mxu2 }
 0xe3b   :  { %v1576_v31 = vadd.f32 %v1570_v28, %v1423_v32 }
 0xe3d   :  { %v1578_v33 = vadd.f32 %v1576_v31, %v2241_v39  ;;  %v1645_v39 = vld [vmem:[#allocation7 + $0x9f0] sm:$0xff] }
 0xe3e   :  { %1647 = vmatpush.msra.mxu3 %v1645_v39  ;;  %v1690_v39 = vld [vmem:[#allocation7 + $0x5e8] sm:$0xff] }
 0xe3f   :  { %v1580_v2 = vmul.f32 %v2139_v52, %v1578_v33 }
 0xe40   :  { %1648 = vmatpush.msra.mxu3 %v1644_v44  ;;  %v1689_v44 = vld [vmem:[#allocation7 + $0x598] sm:$0xff] }
 0xe41   :  { %1582 = vadd.xlane.f32.xlu0 %v1580_v2 }
 0xe92   :  { %v1573_v36 = vpop.f32.mrf.mxu2 }
 0xe93   :  { %v1577_v37 = vadd.f32 %v1573_v36, %v1424_v35  ;;  %v1699_v36 = vld [vmem:[#allocation7 + $0x8b8] sm:$0xff] }
 0xe94   :  { %1709 = vmatpush.msrb.mxu1 %v1699_v36  ;;  %v1793_v36 = vld [vmem:[#allocation5 + $0x150] sm:$0xff] }
 0xe95   :  { %v1579_v6 = vadd.f32 %v1577_v37, %v2252_v26  ;;  %v1643_v26 = vld [vmem:[#allocation7 + $0x950] sm:$0xff]  ;;  %v1698_v37 = vld [vmem:[#allocation7 + $0x868] sm:$0xff] }
 0xe96   :  { %1649 = vmatpush.msra.mxu3 %v1643_v26  ;;  %1710 = vmatpush.msrb.mxu1 %v1698_v37 }
 0xe97   :  { %v1581_v38 = vmul.f32 %v2139_v52, %v1579_v6 }
 0xe98   :  { %1650 = vmatpush.msra.mxu3 %v1642_v51 }
 0xe99   :  { %1584 = vadd.xlane.f32.xlu1 %v1581_v38  ;;  %v1696_v38 = vld [vmem:[#allocation7 + $0x7c8] sm:$0xff] }
 0xe9a   :  { %1651 = vmatpush.msra.mxu3 %v1641_v53 }
 0xe9c   :  { %1652 = vmatpush.msra.mxu3 %v1640_v54 }
 0xe9e   :  { %1653 = vmatpush.msra.mxu3 %v1639_v55 }
 0xea0   :  { %1654 = vmatpush.msra.mxu3 %v1638_v56 }
 0xea2   :  { %1655 = vmatpush.msra.mxu3 %v1637_v57 }
 0xea4   :  { %1656 = vmatpush.msra.mxu3 %v1636_v58 }
 0xea6   :  { %1657 = vmatpush.msra.mxu3 %v1635_v45 }
 0xea8   :  { %1658 = vmatpush.msra.mxu3 %v1634_v59 }
 0xeaa   :  { %1659 = vmatpush.msra.mxu3 %v1633_v61 }
 0xeac   :  { %1660 = vmatpush.msra.mxu3 %v1632_v62 }
 0xeae   :  { %1661 = vmatpush.msra.mxu3 %v1631_v0 }
 0xeb0   :  { %1662 = vmatpush.msra.mxu3 %v1630_v60 }
 0xeb4   :  { %v1583_v40 = vpop.xlane.xlu0 %1582 }
 0xeb5   :  { %v1586_v41 = vmul.f32 0.03125, %v1583_v40  ;;  %v1695_v40 = vld [vmem:[#allocation7 + $0x778] sm:$0xff] }
 0xeb7   :  { %v1588_v13 = vsub.f32 %v1578_v33, %v1586_v41  ;;  %v1694_v41 = vld [vmem:[#allocation7 + $0x728] sm:$0xff] }
 0xeb9   :  { %v1590_v42 = vmul.f32 %v2139_v52, %v1588_v13  ;;  %v1693_v13 = vld [vmem:[#allocation7 + $0x6d8] sm:$0xff] }
 0xebb   :  { %v1592_v43 = vmul.f32 %v1590_v42, %v1590_v42 }
 0xebd   :  { %1594 = vadd.xlane.f32.xlu2 %v1592_v43  ;;  %v1691_v43 = vld [vmem:[#allocation7 + $0x638] sm:$0xff] }
 0xf0c   :  { %v1585_v46 = vpop.xlane.xlu1 %1584 }
 0xf0d   :  { %v1587_v47 = vmul.f32 0.03125, %v1585_v46  ;;  %v1688_v46 = vld [vmem:[#allocation7 + $0x548] sm:$0xff] }
 0xf0f   :  { %v1589_v48 = vsub.f32 %v1579_v6, %v1587_v47  ;;  %v1697_v6 = vld [vmem:[#allocation7 + $0x818] sm:$0xff]  ;;  %v1646_v47 = vperm.slane %v2262_v29, 4 }
 0xf10   :  { %1711 = vmatpush.msrb.mxu1 %v1697_v6  ;;  %v1792_v6 = vld [vmem:[#allocation5 + $0x148] sm:$0xff] }
 0xf11   :  { %v2291_v49 = vmul.f32 %v2139_v52, %v1589_v48 }
 0xf12   :  { %1712 = vmatpush.msrb.mxu1 %v1696_v38  ;;  %v1791_v38 = vld [vmem:[#allocation5 + $0x140] sm:$0xff] }
 0xf13   :  { %v1593_v50 = vmul.f32 %v2291_v49, %v2291_v49 }
 0xf14   :  { %1713 = vmatpush.msrb.mxu1 %v1695_v40  ;;  %v1790_v40 = vld [vmem:[#allocation5 + $0x138] sm:$0xff] }
 0xf15   :  { %1596 = vadd.xlane.f32.xlu0 %v1593_v50 }
 0xf16   :  { %1714 = vmatpush.msrb.mxu1 %v1694_v41  ;;  %v1789_v41 = vld [vmem:[#allocation5 + $0x130] sm:$0xff] }
 0xf18   :  { %1715 = vmatpush.msrb.mxu1 %v1693_v13  ;;  %v1788_v13 = vld [vmem:[#allocation5 + $0x128] sm:$0xff] }
 0xf30   :  { %v1595_v1 = vpop.xlane.xlu2 %1594 }
 0xf31   :  { %v1598_v3 = vmul.f32 0.03125, %v1595_v1 }
 0xf33   :  { %v1600_v4 = vadd.f32 1e-12, %v1598_v3 }
 0xf35   :  { %1927 = vrsqrt.f32 %v1600_v4  ;;  %vm1608_vm1 = vweird.f32 %v1600_v4 }
 0xf3b   :  { %v1928_v22 = vpop.eup %1927 }
 0xf3c   :  { %v1603_v5 = vmul.f32 %v1928_v22, %v1600_v4  ;;  %vm1609_vm0 = vweird.f32 %v1928_v22 }
 0xf3d   :  { %vm1610_vm2 = vmor %vm1608_vm1, %vm1609_vm0 }
 0xf3e   :  { %v1604_v7 = vmul.f32 %v1928_v22, %v1603_v5 }
 0xf40   :  { %v1605_v8 = vmul.f32 0.5, %v1604_v7  ;;  %v1704_v7 = vperm.slane %v2262_v29, 5 }
 0xf42   :  { %v1606_v10 = vsub.f32 1.5, %v1605_v8 }
 0xf44   :  { %v1607_v11 = vmul.f32 %v1928_v22, %v1606_v10 }
 0xf46   :  { %v1611_v27 = vsel %vm1610_vm2, %v1928_v22, %v1607_v11 }
 0xf47   :  { %v1622_v14 = vmul.f32 %v1611_v27, %v1590_v42  ;;  %v1692_v42 = vld [vmem:[#allocation7 + $0x688] sm:$0xff] }
 0xf48   :  { %1716 = vmatpush.msrb.mxu1 %v1692_v42  ;;  %v1787_v42 = vld [vmem:[#allocation5 + $0x120] sm:$0xff] }
 0xf49   :  { %v1625_v16 = vmul.f32 %v1624_v12, %v1622_v14 }
 0xf4a   :  { %1717 = vmatpush.msrb.mxu1 %v1691_v43 }
 0xf4b   :  { %v2297_v17 = vadd.f32 %v1627_v15, %v1625_v16 }
 0xf4c   :  { %1718 = vmatpush.msrb.mxu1 %v1690_v39  ;;  %v1786_v39 = vld [vmem:[#allocation5 + $0x118] sm:$0xff] }
 0xf4d   :  { %1663 = vmatmul.f32.vlgmr.msra.gmra.mxu3 %v2297_v17 }
 0xf4e   :  { %1719 = vmatpush.msrb.mxu1 %v1689_v44  ;;  %v1785_v44 = vld [vmem:[#allocation5 + $0x110] sm:$0xff] }
 0xf50   :  { %1720 = vmatpush.msrb.mxu1 %v1688_v46 }
 0xf88   :  { %v1597_v21 = vpop.xlane.xlu0 %1596 }
 0xf89   :  { %v1599_v23 = vmul.f32 0.03125, %v1597_v21 }
 0xf8b   :  { %v1601_v25 = vadd.f32 1e-12, %v1599_v23 }
 0xf8d   :  { %1929 = vrsqrt.f32 %v1601_v25  ;;  %vm1618_vm4 = vweird.f32 %v1601_v25 }
 0xf93   :  { %v1930_v9 = vpop.eup %1929 }
 0xf94   :  { %v1613_v63 = vmul.f32 %v1930_v9, %v1601_v25  ;;  %vm1619_vm3 = vweird.f32 %v1930_v9 }
 0xf95   :  { %vm1620_vm5 = vmor %vm1618_vm4, %vm1619_vm3 }
 0xf96   :  { %v1614_v30 = vmul.f32 %v1930_v9, %v1613_v63 }
 0xf98   :  { %v1615_v32 = vmul.f32 0.5, %v1614_v30  ;;  %v1800_v30 = vld [vmem:[#allocation5 + $0x188] sm:$0xff] }
 0xf99   :  { %1802 = vmatpush.msra.mxu0 %v1800_v30 }
 0xf9a   :  { %v1616_v28 = vsub.f32 1.5, %v1615_v32  ;;  %v1799_v32 = vld [vmem:[#allocation5 + $0x180] sm:$0xff] }
 0xf9b   :  { %1803 = vmatpush.msra.mxu0 %v1799_v32 }
 0xf9c   :  { %v1617_v31 = vmul.f32 %v1930_v9, %v1616_v28  ;;  %v1798_v28 = vld [vmem:[#allocation5 + $0x178] sm:$0xff] }
 0xf9d   :  { %1804 = vmatpush.msra.mxu0 %v1798_v28 }
 0xf9e   :  { %v1621_v33 = vsel %vm1620_vm5, %v1930_v9, %v1617_v31  ;;  %v1797_v31 = vld [vmem:[#allocation5 + $0x170] sm:$0xff] }
 0xf9f   :  { %v1623_v2 = vmul.f32 %v1621_v33, %v2291_v49  ;;  %1805 = vmatpush.msra.mxu0 %v1797_v31  ;;  %v1796_v33 = vld [vmem:[#allocation5 + $0x168] sm:$0xff] }
 0xfa1   :  { %v1626_v34 = vmul.f32 %v1624_v12, %v1623_v2  ;;  %1806 = vmatpush.msra.mxu0 %v1796_v33 }
 0xfa3   :  { %v1629_v35 = vadd.f32 %v1627_v15, %v1626_v34  ;;  %v1795_v34 = vld [vmem:[#allocation5 + $0x160] sm:$0xff] }
 0xfa4   :  { %1807 = vmatpush.msra.mxu0 %v1795_v34 }
 0xfa5   :  { %1666 = vmatmul.f32.gmra.mxu3 %v1629_v35 }
 0xfd0   :  { %v1664_v48 = vpop.f32.mrf.mxu3 }
 0xfd1   :  { %v1665_v49 = vadd.f32 %v1664_v48, %v1646_v47 }
 0xfd3   :  { %v1672_v26 = vmul.f32 0.044715, %v1665_v49  ;;  %v1670_v56 = vmul.f32 0.5, %v1665_v49 }
 0xfd5   :  { %v1674_v50 = vmul.f32 %v1672_v26, %v1665_v49 }
 0xfd7   :  { %v1676_v51 = vmul.f32 %v1674_v50, %v1665_v49 }
 0xfd9   :  { %v1678_v53 = vadd.f32 %v1676_v51, %v1665_v49 }
 0xfdb   :  { %v1680_v54 = vmul.f32 0.7978846, %v1678_v53 }
 0xfdd   :  { %1931 = vtanh.f32 %v1680_v54 }
 0xfe3   :  { %v1932_v55 = vpop.eup %1931 }
 0xfe4   :  { %v1684_v57 = vadd.f32 1.0, %v1932_v55 }
 0xfe6   :  { %v1686_v58 = vmul.f32 %v1684_v57, %v1670_v56 }
 0xfe8   :  { %1721 = vmatmul.f32.vlgmr.msrb.gmra.mxu1 %v1686_v58 }
0x1028   :  { %v1667_v45 = vpop.f32.mrf.mxu3 }
0x1029   :  { %v1668_v59 = vadd.f32 %v1667_v45, %v1646_v47 }
0x102b   :  { %v1673_v61 = vmul.f32 0.044715, %v1668_v59  ;;  %v1671_v4 = vmul.f32 0.5, %v1668_v59 }
0x102d   :  { %v1675_v62 = vmul.f32 %v1673_v61, %v1668_v59 }
0x102f   :  { %v1677_v0 = vmul.f32 %v1675_v62, %v1668_v59  ;;  %v1774_v62 = vperm.slane %v2262_v29, 6 }
0x1031   :  { %v1679_v60 = vadd.f32 %v1677_v0, %v1668_v59 }
0x1033   :  { %v1681_v1 = vmul.f32 0.7978846, %v1679_v60 }
0x1035   :  { %1933 = vtanh.f32 %v1681_v1 }
0x103b   :  { %v1934_v3 = vpop.eup %1933 }
0x103c   :  { %v1685_v22 = vadd.f32 1.0, %v1934_v3 }
0x103e   :  { %v1687_v5 = vmul.f32 %v1685_v22, %v1671_v4  ;;  %v1777_v4 = vperm.slane %v2262_v29, 7 }
0x1040   :  { %1724 = vmatmul.f32.gmra.mxu1 %v1687_v5 }
0x1065   :  { %v1722_v8 = vpop.f32.mrf.mxu1 }
0x1066   :  { %v1723_v10 = vadd.f32 %v1722_v8, %v1704_v7 }
0x1068   :  { %v1728_v11 = vadd.f32 %v1723_v10, %v2297_v17  ;;  %v1942_v10 = vld [vmem:[#allocation5 + $0x190] sm:$0xff] }
0x106a   :  { %v1730_v12 = vmul.f32 %v2139_v52, %v1728_v11 }
0x106c   :  { %1732 = vadd.xlane.f32.xlu2 %v1730_v12 }
0x10bd   :  { %v1725_v27 = vpop.f32.mrf.mxu1 }
0x10be   :  { %v1726_v14 = vadd.f32 %v1725_v27, %v1704_v7 }
0x10c0   :  { %v1729_v15 = vadd.f32 %v1726_v14, %v1629_v35 }
0x10c2   :  { %v1731_v16 = vmul.f32 %v2139_v52, %v1729_v15 }
0x10c4   :  { %1734 = vadd.xlane.f32.xlu1 %v1731_v16 }
0x10df   :  { %v1733_v18 = vpop.xlane.xlu2 %1732 }
0x10e0   :  { %v1736_v19 = vmul.f32 0.03125, %v1733_v18 }
0x10e2   :  { %v1738_v20 = vsub.f32 %v1728_v11, %v1736_v19  ;;  %v1801_v11 = vperm.slane %v1942_v10, 0 }
0x10e4   :  { %v2307_v21 = vmul.f32 %v2139_v52, %v1738_v20 }
0x10e6   :  { %v1742_v23 = vmul.f32 %v2307_v21, %v2307_v21 }
0x10e8   :  { %1744 = vadd.xlane.f32.xlu1 %v1742_v23 }
0x1137   :  { %v1735_v17 = vpop.xlane.xlu1 %1734 }
0x1138   :  { %v1737_v24 = vmul.f32 0.03125, %v1735_v17 }
0x113a   :  { %v1739_v25 = vsub.f32 %v1729_v15, %v1737_v24 }
0x113c   :  { %v2312_v9 = vmul.f32 %v2139_v52, %v1739_v25  ;;  %v1794_v52 = vld [vmem:[#allocation5 + $0x158] sm:$0xff] }
0x113d   :  { %1808 = vmatpush.msra.mxu0 %v1794_v52 }
0x113e   :  { %v1743_v63 = vmul.f32 %v2312_v9, %v2312_v9 }
0x113f   :  { %1809 = vmatpush.msra.mxu0 %v1793_v36 }
0x1140   :  { %1746 = vadd.xlane.f32.xlu0 %v1743_v63 }
0x1141   :  { %1810 = vmatpush.msra.mxu0 %v1792_v6 }
0x1143   :  { %1811 = vmatpush.msra.mxu0 %v1791_v38 }
0x1145   :  { %1812 = vmatpush.msra.mxu0 %v1790_v40 }
0x1147   :  { %1813 = vmatpush.msra.mxu0 %v1789_v41 }
0x1149   :  { %1814 = vmatpush.msra.mxu0 %v1788_v13 }
0x114b   :  { %1815 = vmatpush.msra.mxu0 %v1787_v42 }
0x114d   :  { %1816 = vmatpush.msra.mxu0 %v1786_v39 }
0x114f   :  { %1817 = vmatpush.msra.mxu0 %v1785_v44 }
0x115b   :  { %v1745_v2 = vpop.xlane.xlu1 %1744 }
0x115c   :  { %v1748_v35 = vmul.f32 0.03125, %v1745_v2 }
0x115e   :  { %v1750_v37 = vadd.f32 1e-12, %v1748_v35 }
0x1160   :  { %1935 = vrsqrt.f32 %v1750_v37  ;;  %vm1758_vm7 = vweird.f32 %v1750_v37 }
0x1166   :  { %v1936_v43 = vpop.eup %1935 }
0x1167   :  { %v1753_v46 = vmul.f32 %v1936_v43, %v1750_v37  ;;  %vm1759_vm6 = vweird.f32 %v1936_v43 }
0x1168   :  { %vm1760_vm8 = vmor %vm1758_vm7, %vm1759_vm6 }
0x1169   :  { %v1754_v49 = vmul.f32 %v1936_v43, %v1753_v46 }
0x116b   :  { %v1755_v50 = vmul.f32 0.5, %v1754_v49 }
0x116d   :  { %v1756_v51 = vsub.f32 1.5, %v1755_v50 }
0x116f   :  { %v1757_v55 = vmul.f32 %v1936_v43, %v1756_v51 }
0x1171   :  { %v1761_v58 = vsel %vm1760_vm8, %v1936_v43, %v1757_v55 }
0x1172   :  { %v1772_v61 = vmul.f32 %v1761_v58, %v2307_v21 }
0x1174   :  { %v1775_v1 = vmul.f32 %v1774_v62, %v1772_v61 }
0x1176   :  { %v1778_v5 = vadd.f32 %v1777_v4, %v1775_v1 }
0x11b3   :  { %v1747_v47 = vpop.xlane.xlu0 %1746 }
0x11b4   :  { %v1749_v48 = vmul.f32 0.03125, %v1747_v47 }
0x11b6   :  { %v1751_v26 = vadd.f32 1e-12, %v1749_v48 }
0x11b8   :  { %1937 = vrsqrt.f32 %v1751_v26  ;;  %vm1768_vm10 = vweird.f32 %v1751_v26 }
0x11be   :  { %v1938_v53 = vpop.eup %1937 }
0x11bf   :  { %v1763_v54 = vmul.f32 %v1938_v53, %v1751_v26  ;;  %vm1769_vm9 = vweird.f32 %v1938_v53 }
0x11c0   :  { %vm1770_vm11 = vmor %vm1768_vm10, %vm1769_vm9 }
0x11c1   :  { %v1764_v56 = vmul.f32 %v1938_v53, %v1763_v54 }
0x11c3   :  { %v1765_v57 = vmul.f32 0.5, %v1764_v56 }
0x11c5   :  { %v1766_v45 = vsub.f32 1.5, %v1765_v57 }
0x11c7   :  { %v1767_v59 = vmul.f32 %v1938_v53, %v1766_v45 }
0x11c9   :  { %v1771_v0 = vsel %vm1770_vm11, %v1938_v53, %v1767_v59 }
0x11ca   :  { %v1773_v60 = vmul.f32 %v1771_v0, %v2312_v9 }
0x11cc   :  { %v1776_v3 = vmul.f32 %v1774_v62, %v1773_v60 }
0x11ce   :  { %v1779_v22 = vadd.f32 %v1777_v4, %v1776_v3 }
0x11d0   :  { %v1781_v7 = vrot.slane %v1779_v22, 7 }
0x11d2   :  { %v1784_v8 = vsel %vm1783_vm12, %v1778_v5, %v1781_v7 }
0x11d3   :  { %1818 = vmatmul.f32.vlgmr.msra.gmra.mxu0 %v1784_v8 }
0x1250   :  { %v1819_v12 = vpop.f32.mrf.mxu0 }
0x1251   :  { %v1820_v27 = vadd.f32 %v1819_v12, %v1801_v11 }
0x1253   :  { %1939 = vtanh.f32 %v1820_v27 }
0x1259   :  { %v1940_v29 = vpop.eup %1939 }
0x125a   :  { %1823 = vst [vmem:[#allocation10] sm:$0x3] %v1940_v29 }
0x125b   :  { %1834 = dma.vmem_to_hbm [thread:$0]  %s1830_s23, 32, %s1832_s26, [#allocation4]  }
0x125c   :  { %2069 = dma.done.wait [#allocation4], 32  }
0x125d   :  { %2070 = vsyncadd [#allocation4], 4294967264 }
0x125e   :  { %1839 = vsyncpa [#allocation3], 1 }
0x125f   :  { %1840 = vsyncpa [#allocation6], 1 }
0x1260   :  { %1841 = vsyncpa [#allocation9], 1 }
0x1261   :  { %1842 = vsyncpa [#allocation4], 1 }

</bundles_post_ra>
